<compile_context>
chip_gen: v6e
topology: v6e:2x2x1
jax: 0.10.0
libtpu: 0.0.40
codegen_flags: <defaults>
</compile_context>

<pallas_src>
import jax
import jax.numpy as jnp
from jax.experimental import pallas as pl
from jax.experimental.pallas import tpu as pltpu

HIGHEST = jax.lax.Precision.HIGHEST  # used only by the pure-JAX reference


def lstm_kernel(x_ref, wih_ref, whh_ref, b_ref, lw_ref, lb_ref, out_ref,
                seq_ref, gates_ref, h_ref, c_ref, dma_sem):
    """Grid = (n_layers,). One grid step processes one LSTM layer over all timesteps.

    x_ref     : (T, B, H)   time-major padded input, memory_space=ANY (DMA'd at l==0)
    wih_ref   : (1, H, 4H)  this layer's input->gates weight (transposed)
    whh_ref   : (1, H, 4H)  this layer's hidden->gates weight (transposed)
    b_ref     : (1, 1, 4H)  b_ih + b_hh
    lw_ref    : (1, H)      final linear weight (row vector)
    lb_ref    : (1, 1)      final linear bias
    out_ref   : (B, 1)      final output (written only at last layer)
    seq_ref   : (T, B, H)   VMEM scratch carrying the layer's I/O sequence across layers
    gates_ref : (T, B, 4H)  VMEM scratch holding the hoisted input projection + bias
    h_ref     : (B, H)      VMEM hidden state
    c_ref     : (B, H)      VMEM cell state
    dma_sem   : ()          DMA semaphore for the one-shot x -> seq copy
    """
    l = pl.program_id(0)
    L = pl.num_programs(0)
    T, B, H = seq_ref.shape

    # Layer 0: DMA the (padded) input sequence into the resident sequence buffer once.
    @pl.when(l == 0)
    def _():
        cp = pltpu.make_async_copy(x_ref, seq_ref, dma_sem)
        cp.start()
        cp.wait()

    # h0 = c0 = zeros for every layer (matches torch.zeros init in forward()).
    h_ref[...] = jnp.zeros_like(h_ref)
    c_ref[...] = jnp.zeros_like(c_ref)

    wih = wih_ref[0]     # (H, 4H)
    whh = whh_ref[0]     # (H, 4H)
    bias = b_ref[0]      # (1, 4H)

    # Hoisted input projection (+ bias) for all timesteps of this layer:
    # one well-shaped (T*B, H) @ (H, 4H) matmul instead of T tiny matmuls in the loop.
    seq_flat = seq_ref[...].reshape(T * B, H)
    gates_ref[...] = (
        jnp.dot(seq_flat, wih, preferred_element_type=jnp.float32) + bias
    ).reshape(T, B, 4 * H)

    def step(t, carry):
        h_prev = h_ref[...]
        # Only the recurrent matmul stays on the serial critical path.
        gates = gates_ref[t] + jnp.dot(h_prev, whh,
                                       preferred_element_type=jnp.float32)
        i_g = jax.nn.sigmoid(gates[:, 0 * H:1 * H])
        f_g = jax.nn.sigmoid(gates[:, 1 * H:2 * H])
        g_g = jnp.tanh(gates[:, 2 * H:3 * H])
        o_g = jax.nn.sigmoid(gates[:, 3 * H:4 * H])
        c_new = f_g * c_ref[...] + i_g * g_g
        h_new = o_g * jnp.tanh(c_new)
        c_ref[...] = c_new
        h_ref[...] = h_new
        seq_ref[t] = h_new                   # this layer's output feeds the next layer
        return carry

    # T=8 is small; full unroll is fine (use a bounded unroll factor if T grows).
    jax.lax.fori_loop(0, T, step, 0, unroll=True)

    # Last layer: Linear(H->1) head on the final hidden state as a VPU/XLU reduction
    # (avoids an N=1 MXU matmul + masked store).
    @pl.when(l == L - 1)
    def _():
        out_ref[...] = (jnp.sum(h_ref[...] * lw_ref[...], axis=-1, keepdims=True)
                        + lb_ref[...])


def lstm_forward(x, w_ih, w_hh, b, lw, lb):
    """x: (B, T, F) batch-first, like the PyTorch module. Returns (B, 1)."""
    B, T, F = x.shape
    L, H, H4 = w_ih.shape
    assert H4 == 4 * H and F <= H

    # Pad batch to the 8-sublane width and features to H; go time-major.
    B_pad = ((B + 7) // 8) * 8
    x_tm = jnp.zeros((T, B_pad, H), jnp.float32)
    x_tm = x_tm.at[:, :B, :F].set(jnp.transpose(x.astype(jnp.float32), (1, 0, 2)))

    out = pl.pallas_call(
        lstm_kernel,
        out_shape=jax.ShapeDtypeStruct((B_pad, 1), jnp.float32),
        grid_spec=pltpu.PrefetchScalarGridSpec(
            num_scalar_prefetch=0,
            grid=(L,),
            in_specs=[
                pl.BlockSpec(memory_space=pl.ANY),                 # x (HBM, DMA'd once)
                pl.BlockSpec((1, H, 4 * H), lambda l: (l, 0, 0)),  # W_ih per layer
                pl.BlockSpec((1, H, 4 * H), lambda l: (l, 0, 0)),  # W_hh per layer
                pl.BlockSpec((1, 1, 4 * H), lambda l: (l, 0, 0)),  # bias per layer
                pl.BlockSpec((1, H), lambda l: (0, 0)),            # linear W (1, H)
                pl.BlockSpec((1, 1), lambda l: (0, 0)),            # linear b
            ],
            out_specs=pl.BlockSpec((B_pad, 1), lambda l: (0, 0)),
            scratch_shapes=[
                pltpu.VMEM((T, B_pad, H), jnp.float32),      # sequence carried across layers
                pltpu.VMEM((T, B_pad, 4 * H), jnp.float32),  # hoisted input-gate projection
                pltpu.VMEM((B_pad, H), jnp.float32),         # h
                pltpu.VMEM((B_pad, H), jnp.float32),         # c
                pltpu.SemaphoreType.DMA(()),                 # x -> seq DMA semaphore
            ],
        ),
        compiler_params=pltpu.CompilerParams(
            dimension_semantics=("arbitrary",),
            vmem_limit_bytes=64 * 1024 * 1024,
        ),
    )(x_tm, w_ih, w_hh, b, lw, lb)
    return out[:B]


def reference_forward(x, w_ih, w_hh, b, lw, lb):
    """Pure-JAX reference matching PyTorch nn.LSTM (eval) + Linear semantics (f32)."""
    B, T, F = x.shape
    L, H, _ = w_ih.shape
    seq = jnp.zeros((B, T, H), jnp.float32).at[:, :, :F].set(x.astype(jnp.float32))
    for l in range(L):
        h = jnp.zeros((B, H), jnp.float32)
        c = jnp.zeros((B, H), jnp.float32)
        outs = []
        for t in range(T):
            gates = (jnp.dot(seq[:, t, :], w_ih[l], precision=HIGHEST)
                     + jnp.dot(h, w_hh[l], precision=HIGHEST) + b[l, 0])
            i_g = jax.nn.sigmoid(gates[:, 0 * H:1 * H])
            f_g = jax.nn.sigmoid(gates[:, 1 * H:2 * H])
            g_g = jnp.tanh(gates[:, 2 * H:3 * H])
            o_g = jax.nn.sigmoid(gates[:, 3 * H:4 * H])
            c = f_g * c + i_g * g_g
            h = o_g * jnp.tanh(c)
            outs.append(h)
        seq = jnp.stack(outs, axis=1)
    return jnp.dot(h, lw.T, precision=HIGHEST) + lb


def init_params(key, n_features, hidden_units, n_layers):
    """Deterministic PyTorch-style uniform(-1/sqrt(H), 1/sqrt(H)) init.

    Returns stacked, transposed, zero-padded weights:
      w_ih: (L, H, 4H)   w_hh: (L, H, 4H)   b: (L, 1, 4H)   lw: (1, H)   lb: (1, 1)
    """
    H = hidden_units
    k = 1.0 / jnp.sqrt(jnp.float32(H))
    keys = jax.random.split(key, 4 * n_layers + 2)
    w_ih_list, w_hh_list, b_list = [], [], []
    for l in range(n_layers):
        in_sz = n_features if l == 0 else H
        wih_t = jax.random.uniform(keys[4 * l + 0], (4 * H, in_sz), jnp.float32, -k, k)
        whh_t = jax.random.uniform(keys[4 * l + 1], (4 * H, H), jnp.float32, -k, k)
        b_ih = jax.random.uniform(keys[4 * l + 2], (4 * H,), jnp.float32, -k, k)
        b_hh = jax.random.uniform(keys[4 * l + 3], (4 * H,), jnp.float32, -k, k)
        # Transpose to (in, 4H) and zero-pad layer-0 input rows up to H.
        wih = jnp.zeros((H, 4 * H), jnp.float32).at[:in_sz, :].set(wih_t.T)
        w_ih_list.append(wih)
        w_hh_list.append(whh_t.T)
        b_list.append((b_ih + b_hh)[None, :])
    kl = 1.0 / jnp.sqrt(jnp.float32(H))
    lw = jax.random.uniform(keys[-2], (1, H), jnp.float32, -kl, kl)    # (1, H)
    lb = jax.random.uniform(keys[-1], (1, 1), jnp.float32, -kl, kl)    # (1, 1)
    return (jnp.stack(w_ih_list), jnp.stack(w_hh_list), jnp.stack(b_list),
            lw, lb)


if __name__ == "__main__":
    # Small, forward-consistent shapes: batch=4, seq=8, n_features=7, hidden=32, layers=3.
    n_features, hidden_units, n_layers = 7, 32, 3
    B, T = 4, 8

    key = jax.random.PRNGKey(0)
    k_x, k_p = jax.random.split(key)
    x = jax.random.normal(k_x, (B, T, n_features), jnp.float32)
    w_ih, w_hh, b, lw, lb = init_params(k_p, n_features, hidden_units, n_layers)

    out = lstm_forward(x, w_ih, w_hh, b, lw, lb)
    out = jax.block_until_ready(out)
    assert out.shape == (B, 1)

    # Note: kernel uses default MXU precision (not HIGHEST); 1e-2 tolerance covers it.
    ref = jax.block_until_ready(reference_forward(x, w_ih, w_hh, b, lw, lb))
    assert jnp.allclose(out, ref, atol=1e-2, rtol=1e-2), (out, ref)

    print("KERNEL_OK")
</pallas_src>

<mosaic_0001>
module attributes {stable_mosaic.version = 11 : i64} {
  func.func @lstm_kernel(%arg0: i32, %arg1: memref<8x8x32xf32, #tpu.memory_space<any>>, %arg2: memref<1x32x128xf32, #tpu.memory_space<vmem>>, %arg3: memref<1x32x128xf32, #tpu.memory_space<vmem>>, %arg4: memref<1x1x128xf32, #tpu.memory_space<vmem>>, %arg5: memref<1x32xf32, #tpu.memory_space<vmem>>, %arg6: memref<1x1xf32, #tpu.memory_space<vmem>>, %arg7: memref<8x1xf32, #tpu.memory_space<vmem>>, %arg8: memref<8x8x32xf32, #tpu.memory_space<vmem>>, %arg9: memref<8x8x128xf32, #tpu.memory_space<vmem>>, %arg10: memref<8x32xf32, #tpu.memory_space<vmem>>, %arg11: memref<8x32xf32, #tpu.memory_space<vmem>>, %arg12: memref<!tpu.dma_semaphore, #tpu.memory_space<semaphore_mem>>) attributes {dimension_semantics = [#tpu.dimension_semantics<arbitrary>], iteration_bounds = array<i64: 3>, scalar_prefetch = 0 : i64, scratch_operands = 5 : i64, tpu.core_type = #tpu.core_type<tc>, window_params = [{}, {transform_indices = @transform_1, window_bounds = array<i64: 1, 32, 128>}, {transform_indices = @transform_2, window_bounds = array<i64: 1, 32, 128>}, {transform_indices = @transform_3, window_bounds = array<i64: 1, 1, 128>}, {pipeline_mode = #tpu.pipeline_mode<synchronous>, transform_indices = @transform_4, window_bounds = array<i64: 1, 32>}, {pipeline_mode = #tpu.pipeline_mode<synchronous>, transform_indices = @transform_5, window_bounds = array<i64: 1, 1>}, {pipeline_mode = #tpu.pipeline_mode<synchronous>, transform_indices = @transform_6, window_bounds = array<i64: 8, 1>}]} {
    %c0_i32 = arith.constant 0 : i32
    %0 = arith.cmpi eq, %arg0, %c0_i32 : i32
    %1 = arith.extui %0 : i1 to i32
    %c0_i32_0 = arith.constant 0 : i32
    %2 = arith.cmpi ne, %1, %c0_i32_0 : i32
    scf.if %2 {
      tpu.enqueue_dma source(%arg1 : memref<8x8x32xf32, #tpu.memory_space<any>>) target(%arg8 : memref<8x8x32xf32, #tpu.memory_space<vmem>>) target_semaphore(%arg12 : memref<!tpu.dma_semaphore, #tpu.memory_space<semaphore_mem>>)
      tpu.wait_dma2 semaphore(%arg12 : memref<!tpu.dma_semaphore, #tpu.memory_space<semaphore_mem>>) src(%arg1 : memref<8x8x32xf32, #tpu.memory_space<any>>) dst(%arg8 : memref<8x8x32xf32, #tpu.memory_space<vmem>>)
    } else {
    }
    %cst = arith.constant 0.000000e+00 : f32
    %3 = vector.broadcast %cst : f32 to vector<8x32xf32>
    %c0 = arith.constant 0 : index
    %c0_1 = arith.constant 0 : index
    %4 = vector.load %arg10[%c0, %c0_1] : memref<8x32xf32, #tpu.memory_space<vmem>>, vector<8x32xf32>
    tpu.vector_store %arg10[%c0, %c0_1], %3 {strides = array<i32>} : memref<8x32xf32, #tpu.memory_space<vmem>>, vector<8x32xf32>,
    %cst_2 = arith.constant 0.000000e+00 : f32
    %5 = vector.broadcast %cst_2 : f32 to vector<8x32xf32>
    %c0_3 = arith.constant 0 : index
    %c0_4 = arith.constant 0 : index
    %6 = vector.load %arg11[%c0_3, %c0_4] : memref<8x32xf32, #tpu.memory_space<vmem>>, vector<8x32xf32>
    tpu.vector_store %arg11[%c0_3, %c0_4], %5 {strides = array<i32>} : memref<8x32xf32, #tpu.memory_space<vmem>>, vector<8x32xf32>,
    %c0_5 = arith.constant 0 : index
    %c0_6 = arith.constant 0 : index
    %c0_7 = arith.constant 0 : index
    %7 = vector.load %arg2[%c0_5, %c0_6, %c0_7] : memref<1x32x128xf32, #tpu.memory_space<vmem>>, vector<1x32x128xf32>
    %8 = vector.shape_cast %7 : vector<1x32x128xf32> to vector<32x128xf32>
    %c0_8 = arith.constant 0 : index
    %c0_9 = arith.constant 0 : index
    %c0_10 = arith.constant 0 : index
    %9 = vector.load %arg3[%c0_8, %c0_9, %c0_10] : memref<1x32x128xf32, #tpu.memory_space<vmem>>, vector<1x32x128xf32>
    %10 = vector.shape_cast %9 : vector<1x32x128xf32> to vector<32x128xf32>
    %c0_11 = arith.constant 0 : index
    %c0_12 = arith.constant 0 : index
    %c0_13 = arith.constant 0 : index
    %11 = vector.load %arg4[%c0_11, %c0_12, %c0_13] : memref<1x1x128xf32, #tpu.memory_space<vmem>>, vector<1x1x128xf32>
    %12 = vector.shape_cast %11 : vector<1x1x128xf32> to vector<1x128xf32>
    %c0_14 = arith.constant 0 : index
    %c0_15 = arith.constant 0 : index
    %c0_16 = arith.constant 0 : index
    %13 = vector.load %arg8[%c0_14, %c0_15, %c0_16] : memref<8x8x32xf32, #tpu.memory_space<vmem>>, vector<8x8x32xf32>
    %14 = vector.shape_cast %13 : vector<8x8x32xf32> to vector<64x32xf32>
    %cst_17 = arith.constant dense<0.000000e+00> : vector<64x128xf32>
    %15 = tpu.matmul %14, %8, %cst_17 {dimension_numbers = #tpu.dot_dimension_numbers<[1], [0], [0], [1], [0, 0, 1, 1], [], []>} : vector<64x32xf32>, vector<32x128xf32>, vector<64x128xf32> -> vector<64x128xf32>
    %16 = vector.broadcast %12 : vector<1x128xf32> to vector<64x128xf32>
    %17 = arith.addf %15, %16 : vector<64x128xf32>
    %18 = vector.shape_cast %17 : vector<64x128xf32> to vector<8x8x128xf32>
    %c0_18 = arith.constant 0 : index
    %c0_19 = arith.constant 0 : index
    %c0_20 = arith.constant 0 : index
    %19 = vector.load %arg9[%c0_18, %c0_19, %c0_20] : memref<8x8x128xf32, #tpu.memory_space<vmem>>, vector<8x8x128xf32>
    tpu.vector_store %arg9[%c0_18, %c0_19, %c0_20], %18 {strides = array<i32>} : memref<8x8x128xf32, #tpu.memory_space<vmem>>, vector<8x8x128xf32>,
    %c0_i32_21 = arith.constant 0 : i32
    %c0_22 = arith.constant 0 : index
    %c0_23 = arith.constant 0 : index
    %20 = vector.load %arg10[%c0_22, %c0_23] : memref<8x32xf32, #tpu.memory_space<vmem>>, vector<8x32xf32>
    %21 = arith.index_cast %c0_i32_21 : i32 to index
    %c0_24 = arith.constant 0 : index
    %c0_25 = arith.constant 0 : index
    %22 = vector.load %arg9[%21, %c0_24, %c0_25] : memref<8x8x128xf32, #tpu.memory_space<vmem>>, vector<1x8x128xf32>
    %23 = vector.shape_cast %22 : vector<1x8x128xf32> to vector<8x128xf32>
    %cst_26 = arith.constant dense<0.000000e+00> : vector<8x128xf32>
    %24 = tpu.matmul %20, %10, %cst_26 {dimension_numbers = #tpu.dot_dimension_numbers<[1], [0], [0], [1], [0, 0, 1, 1], [], []>} : vector<8x32xf32>, vector<32x128xf32>, vector<8x128xf32> -> vector<8x128xf32>
    %25 = arith.addf %23, %24 : vector<8x128xf32>
    %26 = vector.extract_strided_slice %25 {offsets = [0, 0], sizes = [8, 32], strides = [1, 1]} : vector<8x128xf32> to vector<8x32xf32>
    %27 = arith.negf %26 : vector<8x32xf32>
    %28 = math.exp %27 : vector<8x32xf32>
    %cst_27 = arith.constant 1.000000e+00 : f32
    %29 = vector.broadcast %cst_27 : f32 to vector<8x32xf32>
    %30 = arith.addf %29, %28 : vector<8x32xf32>
    %31 = arith.divf %29, %30 : vector<8x32xf32>
    %32 = vector.extract_strided_slice %25 {offsets = [0, 32], sizes = [8, 32], strides = [1, 1]} : vector<8x128xf32> to vector<8x32xf32>
    %33 = arith.negf %32 : vector<8x32xf32>
    %34 = math.exp %33 : vector<8x32xf32>
    %cst_28 = arith.constant 1.000000e+00 : f32
    %35 = vector.broadcast %cst_28 : f32 to vector<8x32xf32>
    %36 = arith.addf %35, %34 : vector<8x32xf32>
    %37 = arith.divf %35, %36 : vector<8x32xf32>
    %38 = vector.extract_strided_slice %25 {offsets = [0, 64], sizes = [8, 32], strides = [1, 1]} : vector<8x128xf32> to vector<8x32xf32>
    %39 = math.tanh %38 : vector<8x32xf32>
    %40 = vector.extract_strided_slice %25 {offsets = [0, 96], sizes = [8, 32], strides = [1, 1]} : vector<8x128xf32> to vector<8x32xf32>
    %41 = arith.negf %40 : vector<8x32xf32>
    %42 = math.exp %41 : vector<8x32xf32>
    %cst_29 = arith.constant 1.000000e+00 : f32
    %43 = vector.broadcast %cst_29 : f32 to vector<8x32xf32>
    %44 = arith.addf %43, %42 : vector<8x32xf32>
    %45 = arith.divf %43, %44 : vector<8x32xf32>
    %c0_30 = arith.constant 0 : index
    %c0_31 = arith.constant 0 : index
    %46 = vector.load %arg11[%c0_30, %c0_31] : memref<8x32xf32, #tpu.memory_space<vmem>>, vector<8x32xf32>
    %47 = arith.mulf %37, %46 : vector<8x32xf32>
    %48 = arith.mulf %31, %39 : vector<8x32xf32>
    %49 = arith.addf %47, %48 : vector<8x32xf32>
    %50 = math.tanh %49 : vector<8x32xf32>
    %51 = arith.mulf %45, %50 : vector<8x32xf32>
    %c0_32 = arith.constant 0 : index
    %c0_33 = arith.constant 0 : index
    %52 = vector.load %arg11[%c0_32, %c0_33] : memref<8x32xf32, #tpu.memory_space<vmem>>, vector<8x32xf32>
    tpu.vector_store %arg11[%c0_32, %c0_33], %49 {strides = array<i32>} : memref<8x32xf32, #tpu.memory_space<vmem>>, vector<8x32xf32>,
    %c0_34 = arith.constant 0 : index
    %c0_35 = arith.constant 0 : index
    %53 = vector.load %arg10[%c0_34, %c0_35] : memref<8x32xf32, #tpu.memory_space<vmem>>, vector<8x32xf32>
    tpu.vector_store %arg10[%c0_34, %c0_35], %51 {strides = array<i32>} : memref<8x32xf32, #tpu.memory_space<vmem>>, vector<8x32xf32>,
    %54 = arith.index_cast %c0_i32_21 : i32 to index
    %c0_36 = arith.constant 0 : index
    %c0_37 = arith.constant 0 : index
    %55 = vector.load %arg8[%54, %c0_36, %c0_37] : memref<8x8x32xf32, #tpu.memory_space<vmem>>, vector<1x8x32xf32>
    %56 = vector.shape_cast %55 : vector<1x8x32xf32> to vector<8x32xf32>
    %57 = vector.shape_cast %51 : vector<8x32xf32> to vector<1x8x32xf32>
    tpu.vector_store %arg8[%54, %c0_36, %c0_37], %57 {strides = array<i32>} : memref<8x8x32xf32, #tpu.memory_space<vmem>>, vector<1x8x32xf32>,
    %c1_i32 = arith.constant 1 : i32
    %c0_38 = arith.constant 0 : index
    %c0_39 = arith.constant 0 : index
    %58 = vector.load %arg10[%c0_38, %c0_39] : memref<8x32xf32, #tpu.memory_space<vmem>>, vector<8x32xf32>
    %59 = arith.index_cast %c1_i32 : i32 to index
    %c0_40 = arith.constant 0 : index
    %c0_41 = arith.constant 0 : index
    %60 = vector.load %arg9[%59, %c0_40, %c0_41] : memref<8x8x128xf32, #tpu.memory_space<vmem>>, vector<1x8x128xf32>
    %61 = vector.shape_cast %60 : vector<1x8x128xf32> to vector<8x128xf32>
    %cst_42 = arith.constant dense<0.000000e+00> : vector<8x128xf32>
    %62 = tpu.matmul %58, %10, %cst_42 {dimension_numbers = #tpu.dot_dimension_numbers<[1], [0], [0], [1], [0, 0, 1, 1], [], []>} : vector<8x32xf32>, vector<32x128xf32>, vector<8x128xf32> -> vector<8x128xf32>
    %63 = arith.addf %61, %62 : vector<8x128xf32>
    %64 = vector.extract_strided_slice %63 {offsets = [0, 0], sizes = [8, 32], strides = [1, 1]} : vector<8x128xf32> to vector<8x32xf32>
    %65 = arith.negf %64 : vector<8x32xf32>
    %66 = math.exp %65 : vector<8x32xf32>
    %cst_43 = arith.constant 1.000000e+00 : f32
    %67 = vector.broadcast %cst_43 : f32 to vector<8x32xf32>
    %68 = arith.addf %67, %66 : vector<8x32xf32>
    %69 = arith.divf %67, %68 : vector<8x32xf32>
    %70 = vector.extract_strided_slice %63 {offsets = [0, 32], sizes = [8, 32], strides = [1, 1]} : vector<8x128xf32> to vector<8x32xf32>
    %71 = arith.negf %70 : vector<8x32xf32>
    %72 = math.exp %71 : vector<8x32xf32>
    %cst_44 = arith.constant 1.000000e+00 : f32
    %73 = vector.broadcast %cst_44 : f32 to vector<8x32xf32>
    %74 = arith.addf %73, %72 : vector<8x32xf32>
    %75 = arith.divf %73, %74 : vector<8x32xf32>
    %76 = vector.extract_strided_slice %63 {offsets = [0, 64], sizes = [8, 32], strides = [1, 1]} : vector<8x128xf32> to vector<8x32xf32>
    %77 = math.tanh %76 : vector<8x32xf32>
    %78 = vector.extract_strided_slice %63 {offsets = [0, 96], sizes = [8, 32], strides = [1, 1]} : vector<8x128xf32> to vector<8x32xf32>
    %79 = arith.negf %78 : vector<8x32xf32>
    %80 = math.exp %79 : vector<8x32xf32>
    %cst_45 = arith.constant 1.000000e+00 : f32
    %81 = vector.broadcast %cst_45 : f32 to vector<8x32xf32>
    %82 = arith.addf %81, %80 : vector<8x32xf32>
    %83 = arith.divf %81, %82 : vector<8x32xf32>
    %c0_46 = arith.constant 0 : index
    %c0_47 = arith.constant 0 : index
    %84 = vector.load %arg11[%c0_46, %c0_47] : memref<8x32xf32, #tpu.memory_space<vmem>>, vector<8x32xf32>
    %85 = arith.mulf %75, %84 : vector<8x32xf32>
    %86 = arith.mulf %69, %77 : vector<8x32xf32>
    %87 = arith.addf %85, %86 : vector<8x32xf32>
    %88 = math.tanh %87 : vector<8x32xf32>
    %89 = arith.mulf %83, %88 : vector<8x32xf32>
    %c0_48 = arith.constant 0 : index
    %c0_49 = arith.constant 0 : index
    %90 = vector.load %arg11[%c0_48, %c0_49] : memref<8x32xf32, #tpu.memory_space<vmem>>, vector<8x32xf32>
    tpu.vector_store %arg11[%c0_48, %c0_49], %87 {strides = array<i32>} : memref<8x32xf32, #tpu.memory_space<vmem>>, vector<8x32xf32>,
    %c0_50 = arith.constant 0 : index
    %c0_51 = arith.constant 0 : index
    %91 = vector.load %arg10[%c0_50, %c0_51] : memref<8x32xf32, #tpu.memory_space<vmem>>, vector<8x32xf32>
    tpu.vector_store %arg10[%c0_50, %c0_51], %89 {strides = array<i32>} : memref<8x32xf32, #tpu.memory_space<vmem>>, vector<8x32xf32>,
    %92 = arith.index_cast %c1_i32 : i32 to index
    %c0_52 = arith.constant 0 : index
    %c0_53 = arith.constant 0 : index
    %93 = vector.load %arg8[%92, %c0_52, %c0_53] : memref<8x8x32xf32, #tpu.memory_space<vmem>>, vector<1x8x32xf32>
    %94 = vector.shape_cast %93 : vector<1x8x32xf32> to vector<8x32xf32>
    %95 = vector.shape_cast %89 : vector<8x32xf32> to vector<1x8x32xf32>
    tpu.vector_store %arg8[%92, %c0_52, %c0_53], %95 {strides = array<i32>} : memref<8x8x32xf32, #tpu.memory_space<vmem>>, vector<1x8x32xf32>,
    %c2_i32 = arith.constant 2 : i32
    %c0_54 = arith.constant 0 : index
    %c0_55 = arith.constant 0 : index
    %96 = vector.load %arg10[%c0_54, %c0_55] : memref<8x32xf32, #tpu.memory_space<vmem>>, vector<8x32xf32>
    %97 = arith.index_cast %c2_i32 : i32 to index
    %c0_56 = arith.constant 0 : index
    %c0_57 = arith.constant 0 : index
    %98 = vector.load %arg9[%97, %c0_56, %c0_57] : memref<8x8x128xf32, #tpu.memory_space<vmem>>, vector<1x8x128xf32>
    %99 = vector.shape_cast %98 : vector<1x8x128xf32> to vector<8x128xf32>
    %cst_58 = arith.constant dense<0.000000e+00> : vector<8x128xf32>
    %100 = tpu.matmul %96, %10, %cst_58 {dimension_numbers = #tpu.dot_dimension_numbers<[1], [0], [0], [1], [0, 0, 1, 1], [], []>} : vector<8x32xf32>, vector<32x128xf32>, vector<8x128xf32> -> vector<8x128xf32>
    %101 = arith.addf %99, %100 : vector<8x128xf32>
    %102 = vector.extract_strided_slice %101 {offsets = [0, 0], sizes = [8, 32], strides = [1, 1]} : vector<8x128xf32> to vector<8x32xf32>
    %103 = arith.negf %102 : vector<8x32xf32>
    %104 = math.exp %103 : vector<8x32xf32>
    %cst_59 = arith.constant 1.000000e+00 : f32
    %105 = vector.broadcast %cst_59 : f32 to vector<8x32xf32>
    %106 = arith.addf %105, %104 : vector<8x32xf32>
    %107 = arith.divf %105, %106 : vector<8x32xf32>
    %108 = vector.extract_strided_slice %101 {offsets = [0, 32], sizes = [8, 32], strides = [1, 1]} : vector<8x128xf32> to vector<8x32xf32>
    %109 = arith.negf %108 : vector<8x32xf32>
    %110 = math.exp %109 : vector<8x32xf32>
    %cst_60 = arith.constant 1.000000e+00 : f32
    %111 = vector.broadcast %cst_60 : f32 to vector<8x32xf32>
    %112 = arith.addf %111, %110 : vector<8x32xf32>
    %113 = arith.divf %111, %112 : vector<8x32xf32>
    %114 = vector.extract_strided_slice %101 {offsets = [0, 64], sizes = [8, 32], strides = [1, 1]} : vector<8x128xf32> to vector<8x32xf32>
    %115 = math.tanh %114 : vector<8x32xf32>
    %116 = vector.extract_strided_slice %101 {offsets = [0, 96], sizes = [8, 32], strides = [1, 1]} : vector<8x128xf32> to vector<8x32xf32>
    %117 = arith.negf %116 : vector<8x32xf32>
    %118 = math.exp %117 : vector<8x32xf32>
    %cst_61 = arith.constant 1.000000e+00 : f32
    %119 = vector.broadcast %cst_61 : f32 to vector<8x32xf32>
    %120 = arith.addf %119, %118 : vector<8x32xf32>
    %121 = arith.divf %119, %120 : vector<8x32xf32>
    %c0_62 = arith.constant 0 : index
    %c0_63 = arith.constant 0 : index
    %122 = vector.load %arg11[%c0_62, %c0_63] : memref<8x32xf32, #tpu.memory_space<vmem>>, vector<8x32xf32>
    %123 = arith.mulf %113, %122 : vector<8x32xf32>
    %124 = arith.mulf %107, %115 : vector<8x32xf32>
    %125 = arith.addf %123, %124 : vector<8x32xf32>
    %126 = math.tanh %125 : vector<8x32xf32>
    %127 = arith.mulf %121, %126 : vector<8x32xf32>
    %c0_64 = arith.constant 0 : index
    %c0_65 = arith.constant 0 : index
    %128 = vector.load %arg11[%c0_64, %c0_65] : memref<8x32xf32, #tpu.memory_space<vmem>>, vector<8x32xf32>
    tpu.vector_store %arg11[%c0_64, %c0_65], %125 {strides = array<i32>} : memref<8x32xf32, #tpu.memory_space<vmem>>, vector<8x32xf32>,
    %c0_66 = arith.constant 0 : index
    %c0_67 = arith.constant 0 : index
    %129 = vector.load %arg10[%c0_66, %c0_67] : memref<8x32xf32, #tpu.memory_space<vmem>>, vector<8x32xf32>
    tpu.vector_store %arg10[%c0_66, %c0_67], %127 {strides = array<i32>} : memref<8x32xf32, #tpu.memory_space<vmem>>, vector<8x32xf32>,
    %130 = arith.index_cast %c2_i32 : i32 to index
    %c0_68 = arith.constant 0 : index
    %c0_69 = arith.constant 0 : index
    %131 = vector.load %arg8[%130, %c0_68, %c0_69] : memref<8x8x32xf32, #tpu.memory_space<vmem>>, vector<1x8x32xf32>
    %132 = vector.shape_cast %131 : vector<1x8x32xf32> to vector<8x32xf32>
    %133 = vector.shape_cast %127 : vector<8x32xf32> to vector<1x8x32xf32>
    tpu.vector_store %arg8[%130, %c0_68, %c0_69], %133 {strides = array<i32>} : memref<8x8x32xf32, #tpu.memory_space<vmem>>, vector<1x8x32xf32>,
    %c3_i32 = arith.constant 3 : i32
    %c0_70 = arith.constant 0 : index
    %c0_71 = arith.constant 0 : index
    %134 = vector.load %arg10[%c0_70, %c0_71] : memref<8x32xf32, #tpu.memory_space<vmem>>, vector<8x32xf32>
    %135 = arith.index_cast %c3_i32 : i32 to index
    %c0_72 = arith.constant 0 : index
    %c0_73 = arith.constant 0 : index
    %136 = vector.load %arg9[%135, %c0_72, %c0_73] : memref<8x8x128xf32, #tpu.memory_space<vmem>>, vector<1x8x128xf32>
    %137 = vector.shape_cast %136 : vector<1x8x128xf32> to vector<8x128xf32>
    %cst_74 = arith.constant dense<0.000000e+00> : vector<8x128xf32>
    %138 = tpu.matmul %134, %10, %cst_74 {dimension_numbers = #tpu.dot_dimension_numbers<[1], [0], [0], [1], [0, 0, 1, 1], [], []>} : vector<8x32xf32>, vector<32x128xf32>, vector<8x128xf32> -> vector<8x128xf32>
    %139 = arith.addf %137, %138 : vector<8x128xf32>
    %140 = vector.extract_strided_slice %139 {offsets = [0, 0], sizes = [8, 32], strides = [1, 1]} : vector<8x128xf32> to vector<8x32xf32>
    %141 = arith.negf %140 : vector<8x32xf32>
    %142 = math.exp %141 : vector<8x32xf32>
    %cst_75 = arith.constant 1.000000e+00 : f32
    %143 = vector.broadcast %cst_75 : f32 to vector<8x32xf32>
    %144 = arith.addf %143, %142 : vector<8x32xf32>
    %145 = arith.divf %143, %144 : vector<8x32xf32>
    %146 = vector.extract_strided_slice %139 {offsets = [0, 32], sizes = [8, 32], strides = [1, 1]} : vector<8x128xf32> to vector<8x32xf32>
    %147 = arith.negf %146 : vector<8x32xf32>
    %148 = math.exp %147 : vector<8x32xf32>
    %cst_76 = arith.constant 1.000000e+00 : f32
    %149 = vector.broadcast %cst_76 : f32 to vector<8x32xf32>
    %150 = arith.addf %149, %148 : vector<8x32xf32>
    %151 = arith.divf %149, %150 : vector<8x32xf32>
    %152 = vector.extract_strided_slice %139 {offsets = [0, 64], sizes = [8, 32], strides = [1, 1]} : vector<8x128xf32> to vector<8x32xf32>
    %153 = math.tanh %152 : vector<8x32xf32>
    %154 = vector.extract_strided_slice %139 {offsets = [0, 96], sizes = [8, 32], strides = [1, 1]} : vector<8x128xf32> to vector<8x32xf32>
    %155 = arith.negf %154 : vector<8x32xf32>
    %156 = math.exp %155 : vector<8x32xf32>
    %cst_77 = arith.constant 1.000000e+00 : f32
    %157 = vector.broadcast %cst_77 : f32 to vector<8x32xf32>
    %158 = arith.addf %157, %156 : vector<8x32xf32>
    %159 = arith.divf %157, %158 : vector<8x32xf32>
    %c0_78 = arith.constant 0 : index
    %c0_79 = arith.constant 0 : index
    %160 = vector.load %arg11[%c0_78, %c0_79] : memref<8x32xf32, #tpu.memory_space<vmem>>, vector<8x32xf32>
    %161 = arith.mulf %151, %160 : vector<8x32xf32>
    %162 = arith.mulf %145, %153 : vector<8x32xf32>
    %163 = arith.addf %161, %162 : vector<8x32xf32>
    %164 = math.tanh %163 : vector<8x32xf32>
    %165 = arith.mulf %159, %164 : vector<8x32xf32>
    %c0_80 = arith.constant 0 : index
    %c0_81 = arith.constant 0 : index
    %166 = vector.load %arg11[%c0_80, %c0_81] : memref<8x32xf32, #tpu.memory_space<vmem>>, vector<8x32xf32>
    tpu.vector_store %arg11[%c0_80, %c0_81], %163 {strides = array<i32>} : memref<8x32xf32, #tpu.memory_space<vmem>>, vector<8x32xf32>,
    %c0_82 = arith.constant 0 : index
    %c0_83 = arith.constant 0 : index
    %167 = vector.load %arg10[%c0_82, %c0_83] : memref<8x32xf32, #tpu.memory_space<vmem>>, vector<8x32xf32>
    tpu.vector_store %arg10[%c0_82, %c0_83], %165 {strides = array<i32>} : memref<8x32xf32, #tpu.memory_space<vmem>>, vector<8x32xf32>,
    %168 = arith.index_cast %c3_i32 : i32 to index
    %c0_84 = arith.constant 0 : index
    %c0_85 = arith.constant 0 : index
    %169 = vector.load %arg8[%168, %c0_84, %c0_85] : memref<8x8x32xf32, #tpu.memory_space<vmem>>, vector<1x8x32xf32>
    %170 = vector.shape_cast %169 : vector<1x8x32xf32> to vector<8x32xf32>
    %171 = vector.shape_cast %165 : vector<8x32xf32> to vector<1x8x32xf32>
    tpu.vector_store %arg8[%168, %c0_84, %c0_85], %171 {strides = array<i32>} : memref<8x8x32xf32, #tpu.memory_space<vmem>>, vector<1x8x32xf32>,
    %c4_i32 = arith.constant 4 : i32
    %c0_86 = arith.constant 0 : index
    %c0_87 = arith.constant 0 : index
    %172 = vector.load %arg10[%c0_86, %c0_87] : memref<8x32xf32, #tpu.memory_space<vmem>>, vector<8x32xf32>
    %173 = arith.index_cast %c4_i32 : i32 to index
    %c0_88 = arith.constant 0 : index
    %c0_89 = arith.constant 0 : index
    %174 = vector.load %arg9[%173, %c0_88, %c0_89] : memref<8x8x128xf32, #tpu.memory_space<vmem>>, vector<1x8x128xf32>
    %175 = vector.shape_cast %174 : vector<1x8x128xf32> to vector<8x128xf32>
    %cst_90 = arith.constant dense<0.000000e+00> : vector<8x128xf32>
    %176 = tpu.matmul %172, %10, %cst_90 {dimension_numbers = #tpu.dot_dimension_numbers<[1], [0], [0], [1], [0, 0, 1, 1], [], []>} : vector<8x32xf32>, vector<32x128xf32>, vector<8x128xf32> -> vector<8x128xf32>
    %177 = arith.addf %175, %176 : vector<8x128xf32>
    %178 = vector.extract_strided_slice %177 {offsets = [0, 0], sizes = [8, 32], strides = [1, 1]} : vector<8x128xf32> to vector<8x32xf32>
    %179 = arith.negf %178 : vector<8x32xf32>
    %180 = math.exp %179 : vector<8x32xf32>
    %cst_91 = arith.constant 1.000000e+00 : f32
    %181 = vector.broadcast %cst_91 : f32 to vector<8x32xf32>
    %182 = arith.addf %181, %180 : vector<8x32xf32>
    %183 = arith.divf %181, %182 : vector<8x32xf32>
    %184 = vector.extract_strided_slice %177 {offsets = [0, 32], sizes = [8, 32], strides = [1, 1]} : vector<8x128xf32> to vector<8x32xf32>
    %185 = arith.negf %184 : vector<8x32xf32>
    %186 = math.exp %185 : vector<8x32xf32>
    %cst_92 = arith.constant 1.000000e+00 : f32
    %187 = vector.broadcast %cst_92 : f32 to vector<8x32xf32>
    %188 = arith.addf %187, %186 : vector<8x32xf32>
    %189 = arith.divf %187, %188 : vector<8x32xf32>
    %190 = vector.extract_strided_slice %177 {offsets = [0, 64], sizes = [8, 32], strides = [1, 1]} : vector<8x128xf32> to vector<8x32xf32>
    %191 = math.tanh %190 : vector<8x32xf32>
    %192 = vector.extract_strided_slice %177 {offsets = [0, 96], sizes = [8, 32], strides = [1, 1]} : vector<8x128xf32> to vector<8x32xf32>
    %193 = arith.negf %192 : vector<8x32xf32>
    %194 = math.exp %193 : vector<8x32xf32>
    %cst_93 = arith.constant 1.000000e+00 : f32
    %195 = vector.broadcast %cst_93 : f32 to vector<8x32xf32>
    %196 = arith.addf %195, %194 : vector<8x32xf32>
    %197 = arith.divf %195, %196 : vector<8x32xf32>
    %c0_94 = arith.constant 0 : index
    %c0_95 = arith.constant 0 : index
    %198 = vector.load %arg11[%c0_94, %c0_95] : memref<8x32xf32, #tpu.memory_space<vmem>>, vector<8x32xf32>
    %199 = arith.mulf %189, %198 : vector<8x32xf32>
    %200 = arith.mulf %183, %191 : vector<8x32xf32>
    %201 = arith.addf %199, %200 : vector<8x32xf32>
    %202 = math.tanh %201 : vector<8x32xf32>
    %203 = arith.mulf %197, %202 : vector<8x32xf32>
    %c0_96 = arith.constant 0 : index
    %c0_97 = arith.constant 0 : index
    %204 = vector.load %arg11[%c0_96, %c0_97] : memref<8x32xf32, #tpu.memory_space<vmem>>, vector<8x32xf32>
    tpu.vector_store %arg11[%c0_96, %c0_97], %201 {strides = array<i32>} : memref<8x32xf32, #tpu.memory_space<vmem>>, vector<8x32xf32>,
    %c0_98 = arith.constant 0 : index
    %c0_99 = arith.constant 0 : index
    %205 = vector.load %arg10[%c0_98, %c0_99] : memref<8x32xf32, #tpu.memory_space<vmem>>, vector<8x32xf32>
    tpu.vector_store %arg10[%c0_98, %c0_99], %203 {strides = array<i32>} : memref<8x32xf32, #tpu.memory_space<vmem>>, vector<8x32xf32>,
    %206 = arith.index_cast %c4_i32 : i32 to index
    %c0_100 = arith.constant 0 : index
    %c0_101 = arith.constant 0 : index
    %207 = vector.load %arg8[%206, %c0_100, %c0_101] : memref<8x8x32xf32, #tpu.memory_space<vmem>>, vector<1x8x32xf32>
    %208 = vector.shape_cast %207 : vector<1x8x32xf32> to vector<8x32xf32>
    %209 = vector.shape_cast %203 : vector<8x32xf32> to vector<1x8x32xf32>
    tpu.vector_store %arg8[%206, %c0_100, %c0_101], %209 {strides = array<i32>} : memref<8x8x32xf32, #tpu.memory_space<vmem>>, vector<1x8x32xf32>,
    %c5_i32 = arith.constant 5 : i32
    %c0_102 = arith.constant 0 : index
    %c0_103 = arith.constant 0 : index
    %210 = vector.load %arg10[%c0_102, %c0_103] : memref<8x32xf32, #tpu.memory_space<vmem>>, vector<8x32xf32>
    %211 = arith.index_cast %c5_i32 : i32 to index
    %c0_104 = arith.constant 0 : index
    %c0_105 = arith.constant 0 : index
    %212 = vector.load %arg9[%211, %c0_104, %c0_105] : memref<8x8x128xf32, #tpu.memory_space<vmem>>, vector<1x8x128xf32>
    %213 = vector.shape_cast %212 : vector<1x8x128xf32> to vector<8x128xf32>
    %cst_106 = arith.constant dense<0.000000e+00> : vector<8x128xf32>
    %214 = tpu.matmul %210, %10, %cst_106 {dimension_numbers = #tpu.dot_dimension_numbers<[1], [0], [0], [1], [0, 0, 1, 1], [], []>} : vector<8x32xf32>, vector<32x128xf32>, vector<8x128xf32> -> vector<8x128xf32>
    %215 = arith.addf %213, %214 : vector<8x128xf32>
    %216 = vector.extract_strided_slice %215 {offsets = [0, 0], sizes = [8, 32], strides = [1, 1]} : vector<8x128xf32> to vector<8x32xf32>
    %217 = arith.negf %216 : vector<8x32xf32>
    %218 = math.exp %217 : vector<8x32xf32>
    %cst_107 = arith.constant 1.000000e+00 : f32
    %219 = vector.broadcast %cst_107 : f32 to vector<8x32xf32>
    %220 = arith.addf %219, %218 : vector<8x32xf32>
    %221 = arith.divf %219, %220 : vector<8x32xf32>
    %222 = vector.extract_strided_slice %215 {offsets = [0, 32], sizes = [8, 32], strides = [1, 1]} : vector<8x128xf32> to vector<8x32xf32>
    %223 = arith.negf %222 : vector<8x32xf32>
    %224 = math.exp %223 : vector<8x32xf32>
    %cst_108 = arith.constant 1.000000e+00 : f32
    %225 = vector.broadcast %cst_108 : f32 to vector<8x32xf32>
    %226 = arith.addf %225, %224 : vector<8x32xf32>
    %227 = arith.divf %225, %226 : vector<8x32xf32>
    %228 = vector.extract_strided_slice %215 {offsets = [0, 64], sizes = [8, 32], strides = [1, 1]} : vector<8x128xf32> to vector<8x32xf32>
    %229 = math.tanh %228 : vector<8x32xf32>
    %230 = vector.extract_strided_slice %215 {offsets = [0, 96], sizes = [8, 32], strides = [1, 1]} : vector<8x128xf32> to vector<8x32xf32>
    %231 = arith.negf %230 : vector<8x32xf32>
    %232 = math.exp %231 : vector<8x32xf32>
    %cst_109 = arith.constant 1.000000e+00 : f32
    %233 = vector.broadcast %cst_109 : f32 to vector<8x32xf32>
    %234 = arith.addf %233, %232 : vector<8x32xf32>
    %235 = arith.divf %233, %234 : vector<8x32xf32>
    %c0_110 = arith.constant 0 : index
    %c0_111 = arith.constant 0 : index
    %236 = vector.load %arg11[%c0_110, %c0_111] : memref<8x32xf32, #tpu.memory_space<vmem>>, vector<8x32xf32>
    %237 = arith.mulf %227, %236 : vector<8x32xf32>
    %238 = arith.mulf %221, %229 : vector<8x32xf32>
    %239 = arith.addf %237, %238 : vector<8x32xf32>
    %240 = math.tanh %239 : vector<8x32xf32>
    %241 = arith.mulf %235, %240 : vector<8x32xf32>
    %c0_112 = arith.constant 0 : index
    %c0_113 = arith.constant 0 : index
    %242 = vector.load %arg11[%c0_112, %c0_113] : memref<8x32xf32, #tpu.memory_space<vmem>>, vector<8x32xf32>
    tpu.vector_store %arg11[%c0_112, %c0_113], %239 {strides = array<i32>} : memref<8x32xf32, #tpu.memory_space<vmem>>, vector<8x32xf32>,
    %c0_114 = arith.constant 0 : index
    %c0_115 = arith.constant 0 : index
    %243 = vector.load %arg10[%c0_114, %c0_115] : memref<8x32xf32, #tpu.memory_space<vmem>>, vector<8x32xf32>
    tpu.vector_store %arg10[%c0_114, %c0_115], %241 {strides = array<i32>} : memref<8x32xf32, #tpu.memory_space<vmem>>, vector<8x32xf32>,
    %244 = arith.index_cast %c5_i32 : i32 to index
    %c0_116 = arith.constant 0 : index
    %c0_117 = arith.constant 0 : index
    %245 = vector.load %arg8[%244, %c0_116, %c0_117] : memref<8x8x32xf32, #tpu.memory_space<vmem>>, vector<1x8x32xf32>
    %246 = vector.shape_cast %245 : vector<1x8x32xf32> to vector<8x32xf32>
    %247 = vector.shape_cast %241 : vector<8x32xf32> to vector<1x8x32xf32>
    tpu.vector_store %arg8[%244, %c0_116, %c0_117], %247 {strides = array<i32>} : memref<8x8x32xf32, #tpu.memory_space<vmem>>, vector<1x8x32xf32>,
    %c6_i32 = arith.constant 6 : i32
    %c0_118 = arith.constant 0 : index
    %c0_119 = arith.constant 0 : index
    %248 = vector.load %arg10[%c0_118, %c0_119] : memref<8x32xf32, #tpu.memory_space<vmem>>, vector<8x32xf32>
    %249 = arith.index_cast %c6_i32 : i32 to index
    %c0_120 = arith.constant 0 : index
    %c0_121 = arith.constant 0 : index
    %250 = vector.load %arg9[%249, %c0_120, %c0_121] : memref<8x8x128xf32, #tpu.memory_space<vmem>>, vector<1x8x128xf32>
    %251 = vector.shape_cast %250 : vector<1x8x128xf32> to vector<8x128xf32>
    %cst_122 = arith.constant dense<0.000000e+00> : vector<8x128xf32>
    %252 = tpu.matmul %248, %10, %cst_122 {dimension_numbers = #tpu.dot_dimension_numbers<[1], [0], [0], [1], [0, 0, 1, 1], [], []>} : vector<8x32xf32>, vector<32x128xf32>, vector<8x128xf32> -> vector<8x128xf32>
    %253 = arith.addf %251, %252 : vector<8x128xf32>
    %254 = vector.extract_strided_slice %253 {offsets = [0, 0], sizes = [8, 32], strides = [1, 1]} : vector<8x128xf32> to vector<8x32xf32>
    %255 = arith.negf %254 : vector<8x32xf32>
    %256 = math.exp %255 : vector<8x32xf32>
    %cst_123 = arith.constant 1.000000e+00 : f32
    %257 = vector.broadcast %cst_123 : f32 to vector<8x32xf32>
    %258 = arith.addf %257, %256 : vector<8x32xf32>
    %259 = arith.divf %257, %258 : vector<8x32xf32>
    %260 = vector.extract_strided_slice %253 {offsets = [0, 32], sizes = [8, 32], strides = [1, 1]} : vector<8x128xf32> to vector<8x32xf32>
    %261 = arith.negf %260 : vector<8x32xf32>
    %262 = math.exp %261 : vector<8x32xf32>
    %cst_124 = arith.constant 1.000000e+00 : f32
    %263 = vector.broadcast %cst_124 : f32 to vector<8x32xf32>
    %264 = arith.addf %263, %262 : vector<8x32xf32>
    %265 = arith.divf %263, %264 : vector<8x32xf32>
    %266 = vector.extract_strided_slice %253 {offsets = [0, 64], sizes = [8, 32], strides = [1, 1]} : vector<8x128xf32> to vector<8x32xf32>
    %267 = math.tanh %266 : vector<8x32xf32>
    %268 = vector.extract_strided_slice %253 {offsets = [0, 96], sizes = [8, 32], strides = [1, 1]} : vector<8x128xf32> to vector<8x32xf32>
    %269 = arith.negf %268 : vector<8x32xf32>
    %270 = math.exp %269 : vector<8x32xf32>
    %cst_125 = arith.constant 1.000000e+00 : f32
    %271 = vector.broadcast %cst_125 : f32 to vector<8x32xf32>
    %272 = arith.addf %271, %270 : vector<8x32xf32>
    %273 = arith.divf %271, %272 : vector<8x32xf32>
    %c0_126 = arith.constant 0 : index
    %c0_127 = arith.constant 0 : index
    %274 = vector.load %arg11[%c0_126, %c0_127] : memref<8x32xf32, #tpu.memory_space<vmem>>, vector<8x32xf32>
    %275 = arith.mulf %265, %274 : vector<8x32xf32>
    %276 = arith.mulf %259, %267 : vector<8x32xf32>
    %277 = arith.addf %275, %276 : vector<8x32xf32>
    %278 = math.tanh %277 : vector<8x32xf32>
    %279 = arith.mulf %273, %278 : vector<8x32xf32>
    %c0_128 = arith.constant 0 : index
    %c0_129 = arith.constant 0 : index
    %280 = vector.load %arg11[%c0_128, %c0_129] : memref<8x32xf32, #tpu.memory_space<vmem>>, vector<8x32xf32>
    tpu.vector_store %arg11[%c0_128, %c0_129], %277 {strides = array<i32>} : memref<8x32xf32, #tpu.memory_space<vmem>>, vector<8x32xf32>,
    %c0_130 = arith.constant 0 : index
    %c0_131 = arith.constant 0 : index
    %281 = vector.load %arg10[%c0_130, %c0_131] : memref<8x32xf32, #tpu.memory_space<vmem>>, vector<8x32xf32>
    tpu.vector_store %arg10[%c0_130, %c0_131], %279 {strides = array<i32>} : memref<8x32xf32, #tpu.memory_space<vmem>>, vector<8x32xf32>,
    %282 = arith.index_cast %c6_i32 : i32 to index
    %c0_132 = arith.constant 0 : index
    %c0_133 = arith.constant 0 : index
    %283 = vector.load %arg8[%282, %c0_132, %c0_133] : memref<8x8x32xf32, #tpu.memory_space<vmem>>, vector<1x8x32xf32>
    %284 = vector.shape_cast %283 : vector<1x8x32xf32> to vector<8x32xf32>
    %285 = vector.shape_cast %279 : vector<8x32xf32> to vector<1x8x32xf32>
    tpu.vector_store %arg8[%282, %c0_132, %c0_133], %285 {strides = array<i32>} : memref<8x8x32xf32, #tpu.memory_space<vmem>>, vector<1x8x32xf32>,
    %c7_i32 = arith.constant 7 : i32
    %c0_134 = arith.constant 0 : index
    %c0_135 = arith.constant 0 : index
    %286 = vector.load %arg10[%c0_134, %c0_135] : memref<8x32xf32, #tpu.memory_space<vmem>>, vector<8x32xf32>
    %287 = arith.index_cast %c7_i32 : i32 to index
    %c0_136 = arith.constant 0 : index
    %c0_137 = arith.constant 0 : index
    %288 = vector.load %arg9[%287, %c0_136, %c0_137] : memref<8x8x128xf32, #tpu.memory_space<vmem>>, vector<1x8x128xf32>
    %289 = vector.shape_cast %288 : vector<1x8x128xf32> to vector<8x128xf32>
    %cst_138 = arith.constant dense<0.000000e+00> : vector<8x128xf32>
    %290 = tpu.matmul %286, %10, %cst_138 {dimension_numbers = #tpu.dot_dimension_numbers<[1], [0], [0], [1], [0, 0, 1, 1], [], []>} : vector<8x32xf32>, vector<32x128xf32>, vector<8x128xf32> -> vector<8x128xf32>
    %291 = arith.addf %289, %290 : vector<8x128xf32>
    %292 = vector.extract_strided_slice %291 {offsets = [0, 0], sizes = [8, 32], strides = [1, 1]} : vector<8x128xf32> to vector<8x32xf32>
    %293 = arith.negf %292 : vector<8x32xf32>
    %294 = math.exp %293 : vector<8x32xf32>
    %cst_139 = arith.constant 1.000000e+00 : f32
    %295 = vector.broadcast %cst_139 : f32 to vector<8x32xf32>
    %296 = arith.addf %295, %294 : vector<8x32xf32>
    %297 = arith.divf %295, %296 : vector<8x32xf32>
    %298 = vector.extract_strided_slice %291 {offsets = [0, 32], sizes = [8, 32], strides = [1, 1]} : vector<8x128xf32> to vector<8x32xf32>
    %299 = arith.negf %298 : vector<8x32xf32>
    %300 = math.exp %299 : vector<8x32xf32>
    %cst_140 = arith.constant 1.000000e+00 : f32
    %301 = vector.broadcast %cst_140 : f32 to vector<8x32xf32>
    %302 = arith.addf %301, %300 : vector<8x32xf32>
    %303 = arith.divf %301, %302 : vector<8x32xf32>
    %304 = vector.extract_strided_slice %291 {offsets = [0, 64], sizes = [8, 32], strides = [1, 1]} : vector<8x128xf32> to vector<8x32xf32>
    %305 = math.tanh %304 : vector<8x32xf32>
    %306 = vector.extract_strided_slice %291 {offsets = [0, 96], sizes = [8, 32], strides = [1, 1]} : vector<8x128xf32> to vector<8x32xf32>
    %307 = arith.negf %306 : vector<8x32xf32>
    %308 = math.exp %307 : vector<8x32xf32>
    %cst_141 = arith.constant 1.000000e+00 : f32
    %309 = vector.broadcast %cst_141 : f32 to vector<8x32xf32>
    %310 = arith.addf %309, %308 : vector<8x32xf32>
    %311 = arith.divf %309, %310 : vector<8x32xf32>
    %c0_142 = arith.constant 0 : index
    %c0_143 = arith.constant 0 : index
    %312 = vector.load %arg11[%c0_142, %c0_143] : memref<8x32xf32, #tpu.memory_space<vmem>>, vector<8x32xf32>
    %313 = arith.mulf %303, %312 : vector<8x32xf32>
    %314 = arith.mulf %297, %305 : vector<8x32xf32>
    %315 = arith.addf %313, %314 : vector<8x32xf32>
    %316 = math.tanh %315 : vector<8x32xf32>
    %317 = arith.mulf %311, %316 : vector<8x32xf32>
    %c0_144 = arith.constant 0 : index
    %c0_145 = arith.constant 0 : index
    %318 = vector.load %arg11[%c0_144, %c0_145] : memref<8x32xf32, #tpu.memory_space<vmem>>, vector<8x32xf32>
    tpu.vector_store %arg11[%c0_144, %c0_145], %315 {strides = array<i32>} : memref<8x32xf32, #tpu.memory_space<vmem>>, vector<8x32xf32>,
    %c0_146 = arith.constant 0 : index
    %c0_147 = arith.constant 0 : index
    %319 = vector.load %arg10[%c0_146, %c0_147] : memref<8x32xf32, #tpu.memory_space<vmem>>, vector<8x32xf32>
    tpu.vector_store %arg10[%c0_146, %c0_147], %317 {strides = array<i32>} : memref<8x32xf32, #tpu.memory_space<vmem>>, vector<8x32xf32>,
    %320 = arith.index_cast %c7_i32 : i32 to index
    %c0_148 = arith.constant 0 : index
    %c0_149 = arith.constant 0 : index
    %321 = vector.load %arg8[%320, %c0_148, %c0_149] : memref<8x8x32xf32, #tpu.memory_space<vmem>>, vector<1x8x32xf32>
    %322 = vector.shape_cast %321 : vector<1x8x32xf32> to vector<8x32xf32>
    %323 = vector.shape_cast %317 : vector<8x32xf32> to vector<1x8x32xf32>
    tpu.vector_store %arg8[%320, %c0_148, %c0_149], %323 {strides = array<i32>} : memref<8x8x32xf32, #tpu.memory_space<vmem>>, vector<1x8x32xf32>,
    %c8_i32 = arith.constant 8 : i32
    %c2_i32_150 = arith.constant 2 : i32
    %324 = arith.cmpi eq, %arg0, %c2_i32_150 : i32
    %325 = arith.extui %324 : i1 to i32
    %c0_i32_151 = arith.constant 0 : i32
    %326 = arith.cmpi ne, %325, %c0_i32_151 : i32
    scf.if %326 {
      %c0_152 = arith.constant 0 : index
      %c0_153 = arith.constant 0 : index
      %327 = vector.load %arg10[%c0_152, %c0_153] : memref<8x32xf32, #tpu.memory_space<vmem>>, vector<8x32xf32>
      %c0_154 = arith.constant 0 : index
      %c0_155 = arith.constant 0 : index
      %328 = vector.load %arg5[%c0_154, %c0_155] : memref<1x32xf32, #tpu.memory_space<vmem>>, vector<1x32xf32>
      %329 = vector.broadcast %328 : vector<1x32xf32> to vector<8x32xf32>
      %330 = arith.mulf %327, %329 : vector<8x32xf32>
      %cst_156 = arith.constant dense<0.000000e+00> : vector<8xf32>
      %331 = vector.multi_reduction <add>, %330, %cst_156 [1] : vector<8x32xf32> to vector<8xf32>
      %332 = vector.shape_cast %331 : vector<8xf32> to vector<8x1xf32>
      %c0_157 = arith.constant 0 : index
      %c0_158 = arith.constant 0 : index
      %333 = vector.load %arg6[%c0_157, %c0_158] : memref<1x1xf32, #tpu.memory_space<vmem>>, vector<1x1xf32>
      %334 = vector.broadcast %333 : vector<1x1xf32> to vector<8x1xf32>
      %335 = arith.addf %332, %334 : vector<8x1xf32>
      %c0_159 = arith.constant 0 : index
      %c0_160 = arith.constant 0 : index
      %336 = vector.load %arg7[%c0_159, %c0_160] : memref<8x1xf32, #tpu.memory_space<vmem>>, vector<8x1xf32>
      tpu.vector_store %arg7[%c0_159, %c0_160], %335 {strides = array<i32>} : memref<8x1xf32, #tpu.memory_space<vmem>>, vector<8x1xf32>,
    } else {
    }
    return
  }
  func.func @transform_1(%arg0: i32) -> (i32, i32, i32) {
    %c0_i32 = arith.constant 0 : i32
    %c0_i32_0 = arith.constant 0 : i32
    %c0_i32_1 = arith.constant 0 : i32
    return %arg0, %c0_i32, %c0_i32_0 : i32, i32, i32
  }
  func.func @transform_2(%arg0: i32) -> (i32, i32, i32) {
    %c0_i32 = arith.constant 0 : i32
    %c0_i32_0 = arith.constant 0 : i32
    %c0_i32_1 = arith.constant 0 : i32
    return %arg0, %c0_i32, %c0_i32_0 : i32, i32, i32
  }
  func.func @transform_3(%arg0: i32) -> (i32, i32, i32) {
    %c0_i32 = arith.constant 0 : i32
    %c0_i32_0 = arith.constant 0 : i32
    %c0_i32_1 = arith.constant 0 : i32
    return %arg0, %c0_i32, %c0_i32_0 : i32, i32, i32
  }
  func.func @transform_4(%arg0: i32) -> (i32, i32) {
    %c0_i32 = arith.constant 0 : i32
    %c0_i32_0 = arith.constant 0 : i32
    %c0_i32_1 = arith.constant 0 : i32
    return %c0_i32, %c0_i32_0 : i32, i32
  }
  func.func @transform_5(%arg0: i32) -> (i32, i32) {
    %c0_i32 = arith.constant 0 : i32
    %c0_i32_0 = arith.constant 0 : i32
    %c0_i32_1 = arith.constant 0 : i32
    return %c0_i32, %c0_i32_0 : i32, i32
  }
  func.func @transform_6(%arg0: i32) -> (i32, i32) {
    %c0_i32 = arith.constant 0 : i32
    %c0_i32_0 = arith.constant 0 : i32
    %c0_i32_1 = arith.constant 0 : i32
    return %c0_i32, %c0_i32_0 : i32, i32
  }
}

</mosaic_0001>

<bundles_post_ra>
// kernel: tpu_custom_call.1
= control target key start
LH: loop header
LB: loop body
LE: loop exit
PB: predicated region body
PF: predicated region fallthrough
CT: control target
= control target key end

     0   :  { %s2419_s0 = inlined_call_operand.hbm [shape: f32[8,8,32], index: 0, kind: input, shape index: {}]   ;;  %s2420_s1 = inlined_call_operand.hbm [shape: f32[3,32,128], index: 1, kind: input, shape index: {}]   ;;  %s2421_s2 = inlined_call_operand.hbm [shape: f32[3,32,128], index: 2, kind: input, shape index: {}]   ;;  %s2422_s3 = inlined_call_operand.vmem [shape: f32[3,1,128], index: 3, kind: input, shape index: {}]   ;;  %s2423_s4 = inlined_call_operand.vmem [shape: f32[1,32], index: 4, kind: input, shape index: {}]   ;;  %s2424_s5 = inlined_call_operand.<no memory space> [shape: f32[1,1], index: 5, kind: input, shape index: {}]   ;;  %s2425_s6 = inlined_call_operand.vmem [shape: f32[8,1], index: 6, kind: output, shape index: {}]  }
   0x1   :  { %v11_v0 = vstv %s2424_s5 }
   0x2   :  { %12 = vst [vmem:[#allocation7] sm:$0x1] %v11_v0 }
   0x3   :  { %13 = vsyncpa [#allocation9], 0 }
   0x4   :  { %15 = vsyncpa [#allocation9 + $0x1], 0 }
   0x5   :  { %16 = vsyncpa [#allocation11], 0 }
   0x6   :  { %18 = vsyncpa [#allocation11 + $0x1], 0  ;;  %s2012_s23 = smov 0   ;;  %s2014_s24 = smov 0  }
   0x7   :  { %s2016_s25 = smov 0   ;;  %s2018_s26 = smov 0  }
   0x8 LB: > { %s2031_s5 = sadd.s32 4294967295, %s1962_s26   ;;  %s2034_s27 = sadd.s32 1, %s1962_s26   ;;  %s1962_s26 = sphi %s2018_s26, %s2440_s26   ;;  %s1958_s25 = sphi %s2016_s25, %s2439_s25   ;;  %s1954_s24 = sphi %s2014_s24, %s2438_s24   ;;  %s1950_s23 = sphi %s2012_s23, %s2437_s23  }
   0x9   : > { %s28_s28 = ssub.s32 %s1962_s26, %s2034_s27  ;;  %s31_s29 = sadd.s32 1, %s1958_s25 }
   0xa   : > { %p29_p0 = scmp.eq.s32.totalorder %s28_s28, 0  ;;  %p38_p1 = scmp.ne.s32.totalorder %s1958_s25, %s1954_s24 }
   0xb   : > { %p39_p2 = scmp.eq.s32.totalorder %s1962_s26, 0  ;;  %p44_p3 = scmp.ne.s32.totalorder %s1954_s24, %s1950_s23 }
   0xc   : > { %s2044_s30 = scalar_select %p29_p0, %s1958_s25, %s31_s29  }
   0xd   : > { %p40_p4 = por %p39_p2, %p38_p1  ;;  %p2426_p5 = scmp.eq.s32.totalorder %s2031_s5, 0 }
   0xe   : > { %p1734_p6 = scmp.lt.s32.totalorder %s1962_s26, 3  ;;  %s2055_s8 = sand.u32 1, %s1958_s25  }
   0xf   : > { %p2050_p7 = por %p2426_p5, %p44_p3  ;;  %s1517_s9 = sshll.u32 %s2055_s8, 5 }
  0x10   : > { %s1558_s10 = sshll.u32 %s1962_s26, 9  ;;  %s193_s14 = scalar_lea.vmem [#allocation8], %s1517_s9 }
  0x11   : > { %s2428_s7 = scalar_select %p2050_p7, 1, 0 }
  0x12   : > { %s2064_s13 = scalar_lea.hbm %s2420_s1, %s1558_s10  ;;  %s200_s15 = sshll.u32 %s193_s14, 4  ;;  %s2068_s15 = int_to_ptr.vmem [resolvable:$true] %s200_s15 }
  0x13   : > { %p2070_p8 = pnand %p1734_p6, %p40_p4  ;;  %s190_s17 = scalar_lea.sflag [#allocation9], %s2055_s8 }
  0x14   : > { %s1840_s18 = scalar_lea.hbm %s2064_s13, 512  ;;  %s1845_s21 = scalar_lea.hbm %s2420_s1, 1536 }
  0x15   : > { %p1841_p10 = scmp.ne.s32.totalorder %s2064_s13, %s1840_s18  ;;  %p1842_p11 = pneg %p2070_p8 }
  0x16   : > { %p1846_p0 = scmp.lt.s32.totalorder %s2064_s13, %s2420_s1  ;;  %p1847_p1 = scmp.lt.s32.totalorder %s1845_s21, %s1840_s18 }
  0x17   : > { %p1843_p12 = pnand %p1842_p11, %p1841_p10 }
  0x18   : > { %p1848_p2 = por %p1847_p1, %p1846_p0 }
  0x19   : > { %p1844_p13 = pneg %p1843_p12 }
  0x1b   : > { %p1849_p3 = pnand %p1848_p2, %p1844_p13 }
  0x1d   : > { %1852 = shalt.err (!%p1849_p3)
}
  0x1e   : > { %s1853_s28 = scalar_lea.vmem %s2068_s15, 512  ;;  %s1964_s29 = smov [#allocation8]  }
  0x1f   : > { %p1854_p4 = scmp.ne.s32.totalorder %s2068_s15, %s1853_s28  ;;  %s1858_s11 = sshll.u32 %s1964_s29, 4  ;;  %s1859_s11 = int_to_ptr.vmem [resolvable:$false] %s1858_s11 }
  0x20   : > { %s1860_s12 = scalar_lea.vmem %s1859_s11, 1024  ;;  %p1861_p12 = scmp.lt.s32.totalorder %s2068_s15, %s1859_s11 }
  0x21   : > { %p1856_p6 = pnand %p1854_p4, %p1842_p11  ;;  %p1862_p5 = scmp.lt.s32.totalorder %s1860_s12, %s1853_s28 }
  0x23   : > { %p1857_p10 = pneg %p1856_p6  ;;  %p1863_p9 = por %p1862_p5, %p1861_p12 }
  0x25   : > { %p1864_p0 = pnand %p1863_p9, %p1857_p10 }
  0x27   : > { %1867 = shalt.err (!%p1864_p0)
}
  0x28   : > { %s1965_s14 = smov 128   ;;  %s1966_s18 = smov 8  }
  0x29   : > { %1730 = dma.hbm_to_vmem [thread:$0]  (!%p2070_p8), %s2064_s13, 512, %s2068_s15, %s190_s17, %s1965_s14, %s1965_s14, %s1966_s18  }
  0x2a   : > { %p235_p5 = scmp.lt.s32.totalorder %s1962_s26, 4  ;;  %s2111_s21 = scalar_lea.hbm %s2421_s2, %s1558_s10 }
  0x2b   : > { %p2430_p9 = scmp.ge.s32.totalorder %s1962_s26, 1  ;;  %s214_s23 = scalar_lea.vmem [#allocation10], %s1517_s9 }
  0x2c   : > { %s221_s28 = sshll.u32 %s214_s23, 4  ;;  %s211_s13 = scalar_lea.sflag [#allocation11], %s2055_s8  ;;  %s2121_s28 = int_to_ptr.vmem [resolvable:$true] %s221_s28 }
  0x2d   : > { %p2115_p13 = pnand %p2430_p9, %p235_p5  ;;  %s1868_s15 = scalar_lea.hbm %s2111_s21, 512 }
  0x2e   : > { %p1869_p1 = scmp.ne.s32.totalorder %s2111_s21, %s1868_s15  ;;  %s1873_s17 = scalar_lea.hbm %s2421_s2, 1536 }
  0x2f   : > { %p1874_p4 = scmp.lt.s32.totalorder %s2111_s21, %s2421_s2  ;;  %p1875_p6 = scmp.lt.s32.totalorder %s1873_s17, %s1868_s15 }
  0x30   : > { %p1871_p2 = pnand %p1869_p1, %p1842_p11 }
  0x31   : > { %p1876_p10 = por %p1875_p6, %p1874_p4 }
  0x32   : > { %p1872_p3 = pneg %p1871_p2 }
  0x34   : > { %p1877_p12 = pnand %p1876_p10, %p1872_p3 }
  0x36   : > { %1880 = shalt.err (!%p1877_p12)
}
  0x37   : > { %s1881_s8 = scalar_lea.vmem %s2121_s28, 512  ;;  %s1967_s9 = smov [#allocation10]  }
  0x38   : > { %p1882_p0 = scmp.ne.s32.totalorder %s2121_s28, %s1881_s8  ;;  %s1886_s12 = sshll.u32 %s1967_s9, 4  ;;  %s1887_s12 = int_to_ptr.vmem [resolvable:$false] %s1886_s12 }
  0x39   : > { %s1888_s19 = scalar_lea.vmem %s1887_s12, 1024  ;;  %p1889_p1 = scmp.lt.s32.totalorder %s2121_s28, %s1887_s12 }
  0x3a   : > { %p1884_p5 = pnand %p1882_p0, %p1842_p11  ;;  %p1890_p2 = scmp.lt.s32.totalorder %s1888_s19, %s1881_s8 }
  0x3c   : > { %p1885_p9 = pneg %p1884_p5  ;;  %p1891_p7 = por %p1890_p2, %p1889_p1 }
  0x3e   : > { %p1892_p4 = pnand %p1891_p7, %p1885_p9 }
  0x40   : > { %1895 = shalt.err (!%p1892_p4)
}
  0x41   : > { %1733 = dma.hbm_to_vmem [thread:$0]  (!%p2070_p8), %s2111_s21, 512, %s2121_s28, %s211_s13, %s1965_s14, %s1965_s14, %s1966_s18  }
  0x42   : > { %239 = sbr.rel (%p2115_p13) target bundleno = 5827 (0x16c3), region = 40  ;;  %s241_s20 = sand.u32 (!%p2115_p13), 1, %s1954_s24  }
  0x43   : > { %s1524_s23 = sshll.u32 (!%p2115_p13), %s241_s20, 5  ;;  %s242_s15 = scalar_lea.sflag (!%p2115_p13), [#allocation9], %s241_s20 }
  0x44   : > { %s2152_s26 = scalar_lea.vmem (!%p2115_p13), [#allocation8], %s1524_s23  ;;  %p2432_p7 = scmp.ne.s32.totalorder (!%p2115_p13), %s2428_s7, 0 }
  0x47   : > { %1937 = dma.done.wait (%p2432_p7), %s242_s15, 512  }
  0x48   : > { %1939 = vsyncadd (%p2432_p7), %s242_s15, 4294966784  ;;  %s251_s16 = scalar_lea.sflag [#allocation11], %s241_s20  ;;  %s2158_s10 = scalar_lea.vmem [#allocation10], %s1524_s23 }
  0x49   : > { %1941 = dma.done.wait (%p2432_p7), %s251_s16, 512  }
  0x4a   : > { %1943 = vsyncadd (%p2432_p7), %s251_s16, 4294966784  ;;  %p284_p8 = scmp.lt.s32.totalorder %s2031_s5, 2  ;;  %s1968_s18 = smov [#allocation2]  }
  0x4b   : > { %s298_s21 = sshll.u32 %s1968_s18, 4  ;;  %p2433_p13 = scmp.eq.s32.totalorder %s2031_s5, 0  ;;  %s299_s21 = int_to_ptr.vmem [resolvable:$true] %s298_s21 }
  0x4c   : > { %s2166_s14 = scalar_select %p284_p8, %s2031_s5, 2 }
  0x4d   : > { %s1906_s17 = scalar_lea.vmem %s299_s21, 1024  ;;  %p1913_p10 = scmp.lt.s32.totalorder %s299_s21, %s299_s21 }
  0x4e   : > { %s286_s13 = scalar_lea.vmem %s2422_s3, %s2166_s14  ;;  %p1907_p11 = scmp.ne.s32.totalorder %s299_s21, %s1906_s17 }
  0x4f   : > { %p1914_p12 = scmp.lt.s32.totalorder %s1906_s17, %s1906_s17 }
  0x50   : > { %p1908_p3 = pnand %p1907_p11, %p2433_p13 }
  0x51   : > { %p1915_p0 = por %p1914_p12, %p1913_p10 }
  0x52   : > { %p1909_p6 = pneg %p1908_p3 }
  0x54   : > { %p1916_p5 = pnand %p1915_p0, %p1909_p6 }
  0x56   : > { %1919 = shalt.err (!%p1916_p5)  }
  0x57   : > { %p2434_p9 = pmov %p2433_p13 }
  0x59   : > { %1725 = dma.hbm_to_vmem [thread:$0]  (%p2434_p9), %s2419_s0, 1024, %s299_s21, [#allocation6] }
  0x5a   : > { %p2435_p1 = pmov %p2434_p9 }
  0x5c   : > { %1945 = dma.done.wait (%p2435_p1), [#allocation6], 1024  ;;  %p2436_p2 = pmov %p2435_p1 }
  0x5d   : > { %vm306_vm0 = vcmask 261120   ;;  %v1969_v1 = vmov 0.0   ;;  %vm1970_vm1 = vmmov 0   ;;  %v312_v2 = vld [vmem:[%s2152_s26 + $0x18] sm:$0xff]  ;;  %v311_v3 = vld [vmem:[%s2152_s26 + $0x10] sm:$0xff]  ;;  %v310_v6 = vld [vmem:[%s2152_s26 + $0x8] sm:$0xff] }
  0x5e   : > { %1947 = vsyncadd (%p2436_p2), [#allocation6], 4294966272  ;;  %1632 = vmatprep.subr.mxu1 %v1969_v1  ;;  %307 = vst.msk [vmem:[#allocation4] sm:$0xff] %vm306_vm0, %v1969_v1  ;;  %1640 = vmatprep.mubr.msk.f32.mxu1 %vm1970_vm1, %v1969_v1  ;;  %v2193_v4 = vld [vmem:[%s2158_s10 + $0x18] sm:$0xff]  ;;  %v2197_v5 = vld [vmem:[%s2158_s10 + $0x10] sm:$0xff]  ;;  %s1971_s9 = smov 64  }
  0x5f   : > { %308 = vst.msk [vmem:[#allocation5] sm:$0xff] %vm306_vm0, %v1969_v1  ;;  %1612 = vmatprep.subr.mxu0 %v312_v2  ;;  %1633 = vmatpush3.msra.mxu1 %v2193_v4  ;;  %v318_v7 = vld [vmem:[#allocation2] sm:$0xff]  ;;  %v309_v9 = vld [vmem:[%s2152_s26] sm:$0xff]  ;;  %v319_v11 = vld [vmem:[#allocation2 + $0x8] sm:$0xff]  ;;  %s1972_s12 = smov 32   ;;  %s1973_s19 = smov 96  }
  0x60   : > { %1613 = vmatpush3.msra.mxu0 %v312_v2  ;;  %1634 = vmatprep.subr.mxu1 %v1969_v1  ;;  %v2203_v8 = vld [vmem:[%s2158_s10 + $0x8] sm:$0xff]  ;;  %v2209_v10 = vld [vmem:[%s2158_s10] sm:$0xff]  ;;  %v323_v58 = vld [vmem:[#allocation2 + $0x28] sm:$0xff]  ;;  %p1552_p4 = scmp.ne.s32.totalorder %s2031_s5, 2 }
  0x61   : > { %1614 = vmatprep.subr.mxu0 %v311_v3  ;;  %1635 = vmatpush3.msra.mxu1 %v2197_v5  ;;  %v2241_v15 = vld [vmem:[%s286_s13] ss:$0 sm:$0xff]  ;;  %v320_v55 = vld [vmem:[#allocation2 + $0x10] sm:$0xff]  ;;  %v321_v56 = vld [vmem:[#allocation2 + $0x18] sm:$0xff] }
  0x62   : > { %1615 = vmatpush3.msra.mxu0 %v311_v3  ;;  %1636 = vmatprep.subr.mxu1 %v1969_v1  ;;  %v322_v57 = vld [vmem:[#allocation2 + $0x20] sm:$0xff]  ;;  %v324_v59 = vld [vmem:[#allocation2 + $0x30] sm:$0xff]  ;;  %v325_v60 = vld [vmem:[#allocation2 + $0x38] sm:$0xff] }
  0x63   : > { %1616 = vmatprep.subr.mxu0 %v310_v6  ;;  %1620 = vmatprep.mubr.msk.f32.mxu0 %vm306_vm0, %v318_v7 }
  0x64   : > { %1617 = vmatpush3.msra.mxu0 %v310_v6  ;;  %1637 = vmatpush3.msra.mxu1 %v2203_v8 }
  0x65   : > { %v469_v12 = vld [vmem:[#allocation4] sm:$0xff]  ;;  %1618 = vmatprep.subr.mxu0 %v309_v9  ;;  %1638 = vmatprep.subr.mxu1 %v1969_v1 }
  0x66   : > { %1619 = vmatpush3.msra.mxu0 %v309_v9  ;;  %1639 = vmatpush3.msra.mxu1 %v2209_v10  ;;  %v552_v21 = vld [vmem:[#allocation5] sm:$0xff] }
  0x67   : > { %1621 = vmatmul.mubr.msk.f32.vlgmr.msra.gmra.mxu0 %vm306_vm0, %v319_v11  ;;  %1641 = vmatmul.mubr.msk.f32.vlgmr.msra.gmra.mxu1 %vm306_vm0, %v469_v12 }
  0x68   : > { %1643 = vmatprep.subr.mxu1 %v1969_v1  ;;  %1651 = vmatprep.mubr.msk.f32.mxu1 %vm1970_vm1, %v1969_v1 }
  0x69   : > { %1644 = vmatpush3.msra.mxu1 %v2193_v4  ;;  %1654 = vmatprep.subr.mxu0 %v1969_v1 }
  0x6a   : > { %1645 = vmatprep.subr.mxu1 %v1969_v1  ;;  %1655 = vmatpush3.msra.mxu0 %v2193_v4 }
  0x6b   : > { %1646 = vmatpush3.msra.mxu1 %v2197_v5  ;;  %1656 = vmatprep.subr.mxu0 %v1969_v1 }
  0x6c   : > { %1647 = vmatprep.subr.mxu1 %v1969_v1  ;;  %1657 = vmatpush3.msra.mxu0 %v2197_v5 }
  0x6d   : > { %1648 = vmatpush3.msra.mxu1 %v2203_v8  ;;  %1658 = vmatprep.subr.mxu0 %v1969_v1 }
  0x6e   : > { %1649 = vmatprep.subr.mxu1 %v1969_v1  ;;  %1659 = vmatpush3.msra.mxu0 %v2203_v8 }
  0x6f   : > { %1650 = vmatpush3.msra.mxu1 %v2209_v10  ;;  %1660 = vmatprep.subr.mxu0 %v1969_v1 }
  0x70   : > { %1661 = vmatpush3.msra.mxu0 %v2209_v10  ;;  %1665 = vmatprep.subr.mxu1 %v1969_v1 }
  0x71   : > { %1676 = vmatprep.subr.mxu0 %v1969_v1  ;;  %1623 = vmatprep.mubr.msk.f32.mxu0 %vm306_vm0, %v320_v55 }
  0x72   : > { %1624 = vmatmul.mubr.msk.f32.gmra.mxu0 %vm306_vm0, %v321_v56 }
  0x73   : > { %1626 = vmatprep.mubr.msk.f32.mxu0 %vm306_vm0, %v322_v57 }
  0x76   : > { %1627 = vmatmul.mubr.msk.f32.gmra.mxu0 %vm306_vm0, %v323_v58 }
  0x77   : > { %1629 = vmatprep.mubr.msk.f32.mxu0 %vm306_vm0, %v324_v59 }
  0x7a   : > { %1630 = vmatmul.mubr.msk.f32.gmra.mxu0 %vm306_vm0, %v325_v60 }
  0x7b   : > { %1662 = vmatprep.mubr.msk.f32.mxu0 %vm1970_vm1, %v1969_v1 }
 0x127   : > { %v1622_v13 = vpop.f32.mrf.mxu0  ;;  %v540_v14 = vpop.f32.mrf.mxu1 }
 0x128   : > { %v428_v39 = vadd.f32 %v1622_v13, %v2241_v15 }
 0x129   : > { %v422_v16 = vpop.f32.mrf.mxu0  ;;  %v1642_v17 = vpop.f32.mrf.mxu1 }
 0x12a   : > { %v423_v18 = vadd.f32 %v2241_v15, %v422_v16 }
 0x12c   : > { %v544_v19 = vadd.f32 %v540_v14, %v423_v18 }
 0x12e   : > { %1776 = vtanh.f32 %v544_v19  ;;  %v1537_v22 = vmul.f32 -1.442695, %v544_v19 }
 0x130   : > { %1778 = vpow2.f32 %v1537_v22 }
 0x132   : > { %v1625_v6 = vpop.f32.mrf.mxu0 }
 0x134   : > { %v432_v7 = vpop.f32.mrf.mxu0 }
 0x135   : > { %v433_v14 = vadd.f32 %v2241_v15, %v432_v7 }
 0x136   : > { %v2294_v9 = vpop.f32.mrf.mxu0 }
 0x138   : > { %v2296_v11 = vpop.f32.mrf.mxu0 }
 0x139   : > { %v443_v59 = vadd.f32 %v2241_v15, %v2296_v11 }
 0x13a   : > { %v2298_v12 = vpop.f32.mrf.mxu0 }
 0x13b   : > { %v1777_v20 = vpop.eup %1776 }
 0x13c   : > { %559 = vrot.lane.b32.xlu0 %v1777_v20, %s1971_s9  ;;  %v2300_v13 = vpop.f32.mrf.mxu0 }
 0x13d   : > { %v1779_v23 = vpop.eup %1778 }
 0x13e   : > { %v548_v24 = vadd.f32 1.0, %v1779_v23 }
 0x140   : > { %554 = vrot.lane.b32.xlu0 %v552_v21, %s1972_s12  ;;  %1780 = vrcp.f32 %v548_v24 }
 0x14d   : > { %v1781_v25 = vpop.eup %1780 }
 0x1ae   : > { %v560_v26 = vpop.permute.xlu0 %559 }
 0x1af   : > { %v562_v27 = vmul.f32 %v1781_v25, %v560_v26 }
 0x1b1   : > { %564 = vrot.lane.b32.xlu1 %v562_v27, %s1972_s12 }
 0x1b2   : > { %v555_v28 = vpop.permute.xlu0 %554 }
 0x1b3   : > { %v557_v29 = vmul.f32 %v1781_v25, %v555_v28 }
 0x223   : > { %v565_v30 = vpop.permute.xlu1 %564 }
 0x224   : > { %v567_v31 = vadd.f32 %v565_v30, %v557_v29 }
 0x226   : > { %1782 = vtanh.f32 %v567_v31 }
 0x233   : > { %v1783_v32 = vpop.eup %1782 }
 0x234   : > { %570 = vrot.lane.b32.xlu1 %v1783_v32, %s1971_s9 }
 0x238   : > { %575 = vrot.lane.b32.xlu1 %v567_v31, %s1973_s19 }
 0x2a6   : > { %v571_v33 = vpop.permute.xlu1 %570 }
 0x2a7   : > { %v573_v34 = vmul.f32 %v1781_v25, %v571_v33 }
 0x2a9   : > { %580 = vrot.lane.b32.xlu0 %v573_v34, %s1972_s12 }
 0x2aa   : > { %v576_v35 = vpop.permute.xlu1 %575 }
 0x2ab   : > { %578 = vst.msk [vmem:[#allocation5] sm:$0xff] %vm306_vm0, %v576_v35 }
 0x2b2   : > { %v669_v36 = vld [vmem:[#allocation5] sm:$0xff] }
 0x2b3   : > { %671 = vrot.lane.b32.xlu1 %v669_v36, %s1972_s12 }
 0x31b   : > { %v581_v37 = vpop.permute.xlu0 %580 }
 0x31c   : > { %583 = vst.msk [vmem:[#allocation4] sm:$0xff] %vm306_vm0, %v581_v37  ;;  %584 = vst.msk [vmem:[#allocation2] sm:$0xff] %vm306_vm0, %v581_v37  ;;  %v438_v37 = vadd.f32 %v1625_v6, %v2241_v15 }
 0x323   : > { %v585_v38 = vld [vmem:[#allocation4] sm:$0xff] }
 0x324   : > { %1652 = vmatmul.mubr.msk.f32.vlgmr.msra.gmra.mxu1 %vm306_vm0, %v585_v38 }
 0x325   : > { %1666 = vmatpush3.msra.mxu1 %v2193_v4  ;;  %1673 = vmatprep.mubr.msk.f32.mxu1 %vm1970_vm1, %v1969_v1  ;;  %v672_v50 = vpop.permute.xlu1 %671 }
 0x326   : > { %1667 = vmatprep.subr.mxu1 %v1969_v1 }
 0x327   : > { %1668 = vmatpush3.msra.mxu1 %v2197_v5 }
 0x328   : > { %1669 = vmatprep.subr.mxu1 %v1969_v1 }
 0x329   : > { %1670 = vmatpush3.msra.mxu1 %v2203_v8 }
 0x32a   : > { %1671 = vmatprep.subr.mxu1 %v1969_v1 }
 0x32b   : > { %1672 = vmatpush3.msra.mxu1 %v2209_v10 }
 0x32c   : > { %1687 = vmatprep.subr.mxu1 %v1969_v1 }
 0x3e4   : > { %v657_v40 = vpop.f32.mrf.mxu1 }
 0x3e5   : > { %v661_v41 = vadd.f32 %v657_v40, %v428_v39 }
 0x3e6   : > { %v1653_v42 = vpop.f32.mrf.mxu1 }
 0x3e7   : > { %1784 = vtanh.f32 %v661_v41  ;;  %v1539_v44 = vmul.f32 -1.442695, %v661_v41 }
 0x3e9   : > { %1786 = vpow2.f32 %v1539_v44 }
 0x3f4   : > { %v1785_v43 = vpop.eup %1784 }
 0x3f5   : > { %676 = vrot.lane.b32.xlu0 %v1785_v43, %s1971_s9 }
 0x3f6   : > { %v1787_v45 = vpop.eup %1786 }
 0x3f7   : > { %v665_v46 = vadd.f32 1.0, %v1787_v45 }
 0x3f9   : > { %1788 = vrcp.f32 %v665_v46 }
 0x406   : > { %v1789_v47 = vpop.eup %1788 }
 0x407   : > { %v674_v51 = vmul.f32 %v1789_v47, %v672_v50 }
 0x467   : > { %v677_v48 = vpop.permute.xlu0 %676 }
 0x468   : > { %v679_v49 = vmul.f32 %v1789_v47, %v677_v48 }
 0x46a   : > { %681 = vrot.lane.b32.xlu0 %v679_v49, %s1972_s12 }
 0x4dc   : > { %v682_v52 = vpop.permute.xlu0 %681 }
 0x4dd   : > { %v684_v53 = vadd.f32 %v682_v52, %v674_v51 }
 0x4df   : > { %1790 = vtanh.f32 %v684_v53 }
 0x4ec   : > { %v1791_v54 = vpop.eup %1790 }
 0x4ed   : > { %687 = vrot.lane.b32.xlu1 %v1791_v54, %s1971_s9 }
 0x4f1   : > { %692 = vrot.lane.b32.xlu1 %v684_v53, %s1973_s19 }
 0x55f   : > { %v688_v61 = vpop.permute.xlu1 %687 }
 0x560   : > { %v690_v62 = vmul.f32 %v1789_v47, %v688_v61 }
 0x562   : > { %697 = vrot.lane.b32.xlu0 %v690_v62, %s1972_s12 }
 0x563   : > { %v693_v63 = vpop.permute.xlu1 %692 }
 0x564   : > { %695 = vst.msk [vmem:[#allocation5] sm:$0xff] %vm306_vm0, %v693_v63 }
 0x56b   : > { %v787_v0 = vld [vmem:[#allocation5] sm:$0xff] }
 0x56c   : > { %789 = vrot.lane.b32.xlu1 %v787_v0, %s1972_s12 }
 0x5d4   : > { %v698_v2 = vpop.permute.xlu0 %697 }
 0x5d5   : > { %700 = vst.msk [vmem:[#allocation4] sm:$0xff] %vm306_vm0, %v698_v2  ;;  %702 = vst.msk [vmem:[#allocation2 + $0x8] sm:$0xff] %vm306_vm0, %v698_v2 }
 0x5dc   : > { %v703_v3 = vld [vmem:[#allocation4] sm:$0xff] }
 0x5dd   : > { %1663 = vmatmul.mubr.msk.f32.vlgmr.msra.gmra.mxu0 %vm306_vm0, %v703_v3 }
 0x5de   : > { %1677 = vmatpush3.msra.mxu0 %v2193_v4  ;;  %1684 = vmatprep.mubr.msk.f32.mxu0 %vm1970_vm1, %v1969_v1  ;;  %v790_v26 = vpop.permute.xlu1 %789 }
 0x5df   : > { %1678 = vmatprep.subr.mxu0 %v1969_v1 }
 0x5e0   : > { %1679 = vmatpush3.msra.mxu0 %v2197_v5 }
 0x5e1   : > { %1680 = vmatprep.subr.mxu0 %v1969_v1 }
 0x5e2   : > { %1681 = vmatpush3.msra.mxu0 %v2203_v8 }
 0x5e3   : > { %1682 = vmatprep.subr.mxu0 %v1969_v1 }
 0x5e4   : > { %1683 = vmatpush3.msra.mxu0 %v2209_v10 }
 0x5e5   : > { %1698 = vmatprep.subr.mxu0 %v1969_v1 }
 0x69d   : > { %v775_v16 = vpop.f32.mrf.mxu0 }
 0x69e   : > { %v779_v17 = vadd.f32 %v775_v16, %v433_v14 }
 0x69f   : > { %v1664_v18 = vpop.f32.mrf.mxu0 }
 0x6a0   : > { %1792 = vtanh.f32 %v779_v17  ;;  %v1541_v20 = vmul.f32 -1.442695, %v779_v17 }
 0x6a2   : > { %1794 = vpow2.f32 %v1541_v20 }
 0x6ad   : > { %v1793_v19 = vpop.eup %1792 }
 0x6ae   : > { %794 = vrot.lane.b32.xlu0 %v1793_v19, %s1971_s9 }
 0x6af   : > { %v1795_v21 = vpop.eup %1794 }
 0x6b0   : > { %v783_v22 = vadd.f32 1.0, %v1795_v21 }
 0x6b2   : > { %1796 = vrcp.f32 %v783_v22 }
 0x6bf   : > { %v1797_v23 = vpop.eup %1796 }
 0x6c0   : > { %v792_v27 = vmul.f32 %v1797_v23, %v790_v26  ;;  %v448_v26 = vadd.f32 %v2294_v9, %v2241_v15 }
 0x720   : > { %v795_v24 = vpop.permute.xlu0 %794 }
 0x721   : > { %v797_v25 = vmul.f32 %v1797_v23, %v795_v24 }
 0x723   : > { %799 = vrot.lane.b32.xlu0 %v797_v25, %s1972_s12 }
 0x795   : > { %v800_v28 = vpop.permute.xlu0 %799 }
 0x796   : > { %v802_v29 = vadd.f32 %v800_v28, %v792_v27 }
 0x798   : > { %1798 = vtanh.f32 %v802_v29 }
 0x7a5   : > { %v1799_v30 = vpop.eup %1798 }
 0x7a6   : > { %805 = vrot.lane.b32.xlu1 %v1799_v30, %s1971_s9 }
 0x7aa   : > { %810 = vrot.lane.b32.xlu1 %v802_v29, %s1973_s19 }
 0x818   : > { %v806_v31 = vpop.permute.xlu1 %805 }
 0x819   : > { %v808_v32 = vmul.f32 %v1797_v23, %v806_v31 }
 0x81b   : > { %815 = vrot.lane.b32.xlu0 %v808_v32, %s1972_s12 }
 0x81c   : > { %v811_v33 = vpop.permute.xlu1 %810 }
 0x81d   : > { %813 = vst.msk [vmem:[#allocation5] sm:$0xff] %vm306_vm0, %v811_v33 }
 0x824   : > { %v905_v34 = vld [vmem:[#allocation5] sm:$0xff] }
 0x825   : > { %907 = vrot.lane.b32.xlu1 %v905_v34, %s1972_s12 }
 0x88d   : > { %v816_v35 = vpop.permute.xlu0 %815 }
 0x88e   : > { %818 = vst.msk [vmem:[#allocation4] sm:$0xff] %vm306_vm0, %v816_v35  ;;  %820 = vst.msk [vmem:[#allocation2 + $0x10] sm:$0xff] %vm306_vm0, %v816_v35 }
 0x895   : > { %v821_v36 = vld [vmem:[#allocation4] sm:$0xff] }
 0x896   : > { %1674 = vmatmul.mubr.msk.f32.vlgmr.msra.gmra.mxu1 %vm306_vm0, %v821_v36 }
 0x897   : > { %1688 = vmatpush3.msra.mxu1 %v2193_v4  ;;  %1695 = vmatprep.mubr.msk.f32.mxu1 %vm1970_vm1, %v1969_v1  ;;  %v908_v48 = vpop.permute.xlu1 %907 }
 0x898   : > { %1689 = vmatprep.subr.mxu1 %v1969_v1 }
 0x899   : > { %1690 = vmatpush3.msra.mxu1 %v2197_v5 }
 0x89a   : > { %1691 = vmatprep.subr.mxu1 %v1969_v1 }
 0x89b   : > { %1692 = vmatpush3.msra.mxu1 %v2203_v8 }
 0x89c   : > { %1693 = vmatprep.subr.mxu1 %v1969_v1 }
 0x89d   : > { %1694 = vmatpush3.msra.mxu1 %v2209_v10 }
 0x89e   : > { %1709 = vmatprep.subr.mxu1 %v1969_v1 }
 0x956   : > { %v893_v38 = vpop.f32.mrf.mxu1 }
 0x957   : > { %v897_v39 = vadd.f32 %v893_v38, %v438_v37 }
 0x958   : > { %v1675_v40 = vpop.f32.mrf.mxu1 }
 0x959   : > { %1800 = vtanh.f32 %v897_v39  ;;  %v1543_v42 = vmul.f32 -1.442695, %v897_v39 }
 0x95b   : > { %1802 = vpow2.f32 %v1543_v42  ;;  %v453_v42 = vadd.f32 %v2241_v15, %v2300_v13 }
 0x966   : > { %v1801_v41 = vpop.eup %1800 }
 0x967   : > { %912 = vrot.lane.b32.xlu0 %v1801_v41, %s1971_s9 }
 0x968   : > { %v1803_v43 = vpop.eup %1802 }
 0x969   : > { %v901_v44 = vadd.f32 1.0, %v1803_v43 }
 0x96b   : > { %1804 = vrcp.f32 %v901_v44 }
 0x978   : > { %v1805_v45 = vpop.eup %1804 }
 0x979   : > { %v910_v49 = vmul.f32 %v1805_v45, %v908_v48 }
 0x9d9   : > { %v913_v46 = vpop.permute.xlu0 %912 }
 0x9da   : > { %v915_v47 = vmul.f32 %v1805_v45, %v913_v46 }
 0x9dc   : > { %917 = vrot.lane.b32.xlu0 %v915_v47, %s1972_s12 }
 0xa4e   : > { %v918_v50 = vpop.permute.xlu0 %917 }
 0xa4f   : > { %v920_v51 = vadd.f32 %v918_v50, %v910_v49 }
 0xa51   : > { %1806 = vtanh.f32 %v920_v51 }
 0xa5e   : > { %v1807_v52 = vpop.eup %1806 }
 0xa5f   : > { %923 = vrot.lane.b32.xlu1 %v1807_v52, %s1971_s9 }
 0xa63   : > { %928 = vrot.lane.b32.xlu1 %v920_v51, %s1973_s19 }
 0xad1   : > { %v924_v53 = vpop.permute.xlu1 %923 }
 0xad2   : > { %v926_v54 = vmul.f32 %v1805_v45, %v924_v53 }
 0xad4   : > { %933 = vrot.lane.b32.xlu0 %v926_v54, %s1972_s12 }
 0xad5   : > { %v929_v55 = vpop.permute.xlu1 %928 }
 0xad6   : > { %931 = vst.msk [vmem:[#allocation5] sm:$0xff] %vm306_vm0, %v929_v55 }
 0xadd   : > { %v1023_v56 = vld [vmem:[#allocation5] sm:$0xff] }
 0xade   : > { %1025 = vrot.lane.b32.xlu1 %v1023_v56, %s1972_s12 }
 0xb46   : > { %v934_v57 = vpop.permute.xlu0 %933 }
 0xb47   : > { %936 = vst.msk [vmem:[#allocation4] sm:$0xff] %vm306_vm0, %v934_v57  ;;  %938 = vst.msk [vmem:[#allocation2 + $0x18] sm:$0xff] %vm306_vm0, %v934_v57 }
 0xb4e   : > { %v939_v58 = vld [vmem:[#allocation4] sm:$0xff] }
 0xb4f   : > { %1685 = vmatmul.mubr.msk.f32.vlgmr.msra.gmra.mxu0 %vm306_vm0, %v939_v58 }
 0xb50   : > { %1699 = vmatpush3.msra.mxu0 %v2193_v4  ;;  %1706 = vmatprep.mubr.msk.f32.mxu0 %vm1970_vm1, %v1969_v1  ;;  %v1026_v16 = vpop.permute.xlu1 %1025 }
 0xb51   : > { %1700 = vmatprep.subr.mxu0 %v1969_v1 }
 0xb52   : > { %1701 = vmatpush3.msra.mxu0 %v2197_v5 }
 0xb53   : > { %1702 = vmatprep.subr.mxu0 %v1969_v1 }
 0xb54   : > { %1703 = vmatpush3.msra.mxu0 %v2203_v8 }
 0xb55   : > { %1704 = vmatprep.subr.mxu0 %v1969_v1 }
 0xb56   : > { %1705 = vmatpush3.msra.mxu0 %v2209_v10 }
 0xc0f   : > { %v1011_v60 = vpop.f32.mrf.mxu0 }
 0xc10   : > { %v1015_v61 = vadd.f32 %v1011_v60, %v443_v59 }
 0xc11   : > { %v1686_v62 = vpop.f32.mrf.mxu0 }
 0xc12   : > { %1808 = vtanh.f32 %v1015_v61  ;;  %v1545_v0 = vmul.f32 -1.442695, %v1015_v61 }
 0xc14   : > { %1810 = vpow2.f32 %v1545_v0 }
 0xc1f   : > { %v1809_v63 = vpop.eup %1808 }
 0xc20   : > { %1030 = vrot.lane.b32.xlu0 %v1809_v63, %s1971_s9  ;;  %v458_v63 = vadd.f32 %v2298_v12, %v2241_v15 }
 0xc21   : > { %v1811_v2 = vpop.eup %1810 }
 0xc22   : > { %v1019_v3 = vadd.f32 1.0, %v1811_v2 }
 0xc24   : > { %1812 = vrcp.f32 %v1019_v3 }
 0xc31   : > { %v1813_v6 = vpop.eup %1812 }
 0xc32   : > { %v1028_v17 = vmul.f32 %v1813_v6, %v1026_v16 }
 0xc92   : > { %v1031_v7 = vpop.permute.xlu0 %1030 }
 0xc93   : > { %v1033_v14 = vmul.f32 %v1813_v6, %v1031_v7 }
 0xc95   : > { %1035 = vrot.lane.b32.xlu0 %v1033_v14, %s1972_s12 }
 0xd07   : > { %v1036_v11 = vpop.permute.xlu0 %1035 }
 0xd08   : > { %v1038_v18 = vadd.f32 %v1036_v11, %v1028_v17 }
 0xd0a   : > { %1814 = vtanh.f32 %v1038_v18 }
 0xd17   : > { %v1815_v19 = vpop.eup %1814 }
 0xd18   : > { %1041 = vrot.lane.b32.xlu1 %v1815_v19, %s1971_s9 }
 0xd1c   : > { %1046 = vrot.lane.b32.xlu1 %v1038_v18, %s1973_s19 }
 0xd8a   : > { %v1042_v20 = vpop.permute.xlu1 %1041 }
 0xd8b   : > { %v1044_v21 = vmul.f32 %v1813_v6, %v1042_v20 }
 0xd8d   : > { %1051 = vrot.lane.b32.xlu0 %v1044_v21, %s1972_s12 }
 0xd8e   : > { %v1047_v22 = vpop.permute.xlu1 %1046 }
 0xd8f   : > { %1049 = vst.msk [vmem:[#allocation5] sm:$0xff] %vm306_vm0, %v1047_v22 }
 0xd96   : > { %v1141_v23 = vld [vmem:[#allocation5] sm:$0xff] }
 0xd97   : > { %1143 = vrot.lane.b32.xlu1 %v1141_v23, %s1972_s12 }
 0xdff   : > { %v1052_v24 = vpop.permute.xlu0 %1051 }
 0xe00   : > { %1054 = vst.msk [vmem:[#allocation4] sm:$0xff] %vm306_vm0, %v1052_v24  ;;  %1056 = vst.msk [vmem:[#allocation2 + $0x20] sm:$0xff] %vm306_vm0, %v1052_v24 }
 0xe07   : > { %v1057_v25 = vld [vmem:[#allocation4] sm:$0xff] }
 0xe08   : > { %1696 = vmatmul.mubr.msk.f32.vlgmr.msra.gmra.mxu1 %vm306_vm0, %v1057_v25 }
 0xe09   : > { %1710 = vmatpush3.msra.mxu1 %v2193_v4  ;;  %1717 = vmatprep.mubr.msk.f32.mxu1 %vm1970_vm1, %v1969_v1 }
 0xe0a   : > { %1711 = vmatprep.subr.mxu1 %v1969_v1 }
 0xe0b   : > { %1712 = vmatpush3.msra.mxu1 %v2197_v5 }
 0xe0c   : > { %1713 = vmatprep.subr.mxu1 %v1969_v1 }
 0xe0d   : > { %1714 = vmatpush3.msra.mxu1 %v2203_v8 }
 0xe0e   : > { %1715 = vmatprep.subr.mxu1 %v1969_v1 }
 0xe0f   : > { %1716 = vmatpush3.msra.mxu1 %v2209_v10  ;;  %v1144_v10 = vpop.permute.xlu1 %1143 }
 0xec8   : > { %v1129_v27 = vpop.f32.mrf.mxu1 }
 0xec9   : > { %v1133_v4 = vadd.f32 %v1129_v27, %v448_v26 }
 0xeca   : > { %v1697_v28 = vpop.f32.mrf.mxu1 }
 0xecb   : > { %1816 = vtanh.f32 %v1133_v4  ;;  %v1547_v30 = vmul.f32 -1.442695, %v1133_v4 }
 0xecd   : > { %1818 = vpow2.f32 %v1547_v30 }
 0xed8   : > { %v1817_v29 = vpop.eup %1816 }
 0xed9   : > { %1148 = vrot.lane.b32.xlu0 %v1817_v29, %s1971_s9 }
 0xeda   : > { %v1819_v5 = vpop.eup %1818 }
 0xedb   : > { %v1137_v31 = vadd.f32 1.0, %v1819_v5 }
 0xedd   : > { %1820 = vrcp.f32 %v1137_v31 }
 0xeea   : > { %v1821_v8 = vpop.eup %1820 }
 0xeeb   : > { %v1146_v33 = vmul.f32 %v1821_v8, %v1144_v10 }
 0xf4b   : > { %v1149_v32 = vpop.permute.xlu0 %1148 }
 0xf4c   : > { %v1151_v1 = vmul.f32 %v1821_v8, %v1149_v32 }
 0xf4e   : > { %1153 = vrot.lane.b32.xlu0 %v1151_v1, %s1972_s12 }
 0xfc0   : > { %v1154_v9 = vpop.permute.xlu0 %1153 }
 0xfc1   : > { %v1156_v34 = vadd.f32 %v1154_v9, %v1146_v33 }
 0xfc3   : > { %1822 = vtanh.f32 %v1156_v34 }
 0xfd0   : > { %v1823_v35 = vpop.eup %1822 }
 0xfd1   : > { %1159 = vrot.lane.b32.xlu1 %v1823_v35, %s1971_s9 }
 0xfd5   : > { %1164 = vrot.lane.b32.xlu1 %v1156_v34, %s1973_s19 }
0x1043   : > { %v1160_v36 = vpop.permute.xlu1 %1159 }
0x1044   : > { %v1162_v37 = vmul.f32 %v1821_v8, %v1160_v36 }
0x1046   : > { %1169 = vrot.lane.b32.xlu0 %v1162_v37, %s1972_s12 }
0x1047   : > { %v1165_v38 = vpop.permute.xlu1 %1164 }
0x1048   : > { %1167 = vst.msk [vmem:[#allocation5] sm:$0xff] %vm306_vm0, %v1165_v38 }
0x104f   : > { %v1259_v39 = vld [vmem:[#allocation5] sm:$0xff] }
0x1050   : > { %1261 = vrot.lane.b32.xlu1 %v1259_v39, %s1972_s12 }
0x10b8   : > { %v1170_v40 = vpop.permute.xlu0 %1169 }
0x10b9   : > { %1172 = vst.msk [vmem:[#allocation4] sm:$0xff] %vm306_vm0, %v1170_v40  ;;  %1174 = vst.msk [vmem:[#allocation2 + $0x28] sm:$0xff] %vm306_vm0, %v1170_v40 }
0x10c0   : > { %v1175_v41 = vld [vmem:[#allocation4] sm:$0xff] }
0x10c1   : > { %1707 = vmatmul.mubr.msk.f32.vlgmr.msra.gmra.mxu0 %vm306_vm0, %v1175_v41 }
0x10c2   : > { %v1262_v53 = vpop.permute.xlu1 %1261 }
0x1181   : > { %v1247_v43 = vpop.f32.mrf.mxu0 }
0x1182   : > { %v1251_v44 = vadd.f32 %v1247_v43, %v453_v42 }
0x1183   : > { %v1708_v45 = vpop.f32.mrf.mxu0 }
0x1184   : > { %1824 = vtanh.f32 %v1251_v44  ;;  %v1549_v47 = vmul.f32 -1.442695, %v1251_v44 }
0x1186   : > { %1826 = vpow2.f32 %v1549_v47 }
0x1191   : > { %v1825_v46 = vpop.eup %1824 }
0x1192   : > { %1266 = vrot.lane.b32.xlu0 %v1825_v46, %s1971_s9 }
0x1193   : > { %v1827_v48 = vpop.eup %1826 }
0x1194   : > { %v1255_v49 = vadd.f32 1.0, %v1827_v48 }
0x1196   : > { %1828 = vrcp.f32 %v1255_v49 }
0x11a3   : > { %v1829_v50 = vpop.eup %1828 }
0x11a4   : > { %v1264_v54 = vmul.f32 %v1829_v50, %v1262_v53 }
0x1204   : > { %v1267_v51 = vpop.permute.xlu0 %1266 }
0x1205   : > { %v1269_v52 = vmul.f32 %v1829_v50, %v1267_v51 }
0x1207   : > { %1271 = vrot.lane.b32.xlu0 %v1269_v52, %s1972_s12 }
0x1279   : > { %v1272_v13 = vpop.permute.xlu0 %1271 }
0x127a   : > { %v1274_v55 = vadd.f32 %v1272_v13, %v1264_v54 }
0x127c   : > { %1830 = vtanh.f32 %v1274_v55 }
0x1289   : > { %v1831_v56 = vpop.eup %1830 }
0x128a   : > { %1277 = vrot.lane.b32.xlu1 %v1831_v56, %s1971_s9 }
0x128e   : > { %1282 = vrot.lane.b32.xlu1 %v1274_v55, %s1973_s19 }
0x12fc   : > { %v1278_v57 = vpop.permute.xlu1 %1277 }
0x12fd   : > { %v1280_v58 = vmul.f32 %v1829_v50, %v1278_v57 }
0x12ff   : > { %1287 = vrot.lane.b32.xlu0 %v1280_v58, %s1972_s12 }
0x1300   : > { %v1283_v59 = vpop.permute.xlu1 %1282 }
0x1301   : > { %1285 = vst.msk [vmem:[#allocation5] sm:$0xff] %vm306_vm0, %v1283_v59 }
0x1308   : > { %v1377_v60 = vld [vmem:[#allocation5] sm:$0xff] }
0x1309   : > { %1379 = vrot.lane.b32.xlu1 %v1377_v60, %s1972_s12 }
0x1371   : > { %v1288_v61 = vpop.permute.xlu0 %1287 }
0x1372   : > { %1290 = vst.msk [vmem:[#allocation4] sm:$0xff] %vm306_vm0, %v1288_v61  ;;  %1292 = vst.msk [vmem:[#allocation2 + $0x30] sm:$0xff] %vm306_vm0, %v1288_v61 }
0x1379   : > { %v1293_v62 = vld [vmem:[#allocation4] sm:$0xff] }
0x137a   : > { %1718 = vmatmul.mubr.msk.f32.vlgmr.msra.gmra.mxu1 %vm306_vm0, %v1293_v62 }
0x137b   : > { %v1380_v19 = vpop.permute.xlu1 %1379 }
0x143a   : > { %v1365_v0 = vpop.f32.mrf.mxu1 }
0x143b   : > { %v1369_v2 = vadd.f32 %v1365_v0, %v458_v63 }
0x143c   : > { %v1719_v3 = vpop.f32.mrf.mxu1 }
0x143d   : > { %1832 = vtanh.f32 %v1369_v2  ;;  %v1551_v7 = vmul.f32 -1.442695, %v1369_v2 }
0x143f   : > { %1834 = vpow2.f32 %v1551_v7 }
0x144a   : > { %v1833_v6 = vpop.eup %1832 }
0x144b   : > { %1384 = vrot.lane.b32.xlu0 %v1833_v6, %s1971_s9 }
0x144c   : > { %v1835_v14 = vpop.eup %1834 }
0x144d   : > { %v1373_v16 = vadd.f32 1.0, %v1835_v14 }
0x144f   : > { %1836 = vrcp.f32 %v1373_v16 }
0x145c   : > { %v1837_v17 = vpop.eup %1836 }
0x145d   : > { %v1382_v20 = vmul.f32 %v1837_v17, %v1380_v19 }
0x14bd   : > { %v1385_v11 = vpop.permute.xlu0 %1384 }
0x14be   : > { %v1387_v18 = vmul.f32 %v1837_v17, %v1385_v11 }
0x14c0   : > { %1389 = vrot.lane.b32.xlu0 %v1387_v18, %s1972_s12 }
0x1532   : > { %v1390_v15 = vpop.permute.xlu0 %1389 }
0x1533   : > { %v1392_v12 = vadd.f32 %v1390_v15, %v1382_v20 }
0x1535   : > { %1838 = vtanh.f32 %v1392_v12  ;;  %1400 = vrot.lane.b32.xlu0 %v1392_v12, %s1973_s19 }
0x1542   : > { %v1839_v21 = vpop.eup %1838 }
0x1543   : > { %1395 = vrot.lane.b32.xlu1 %v1839_v21, %s1971_s9 }
0x15a7   : > { %v1401_v22 = vpop.permute.xlu0 %1400 }
0x15a8   : > { %1403 = vst.msk [vmem:[#allocation5] sm:$0xff] %vm306_vm0, %v1401_v22 }
0x15b5   : > { %v1396_v23 = vpop.permute.xlu1 %1395 }
0x15b6   : > { %v1398_v24 = vmul.f32 %v1837_v17, %v1396_v23 }
0x15b8   : > { %1405 = vrot.lane.b32.xlu1 %v1398_v24, %s1972_s12 }
0x1627   : > { %1414 = sbr.rel (%p1552_p4) target bundleno = 5827 (0x16c3), region = 60 }
0x162a   : > { %v1406_v25 = vpop.permute.xlu1 %1405 }
0x162b   : > { %1408 = vst.msk [vmem:[#allocation4] sm:$0xff] %vm306_vm0, %v1406_v25  ;;  %1410 = vst.msk [vmem:[#allocation2 + $0x38] sm:$0xff] %vm306_vm0, %v1406_v25 }
0x162c   : > { %v1553_v27 = vld [vmem:[%s2423_s4] ss:$0 sm:$0xff]  ;;  %v1554_v29 = vld [vmem:[#allocation7] ss:$0 sm:$0xff]  ;;  %vm1435_vm2 = vcmask 7168  }
0x1632   : > { %v1415_v26 = vld [vmem:[#allocation4] sm:$0xff] }
0x1633   : > { %v1423_v4 = vmul.f32 %v1553_v27, %v1415_v26 }
0x1635   : > { %v1424_v28 = vsel %vm306_vm0, %v1423_v4, 0.0 }
0x1636   : > { %1425 = vadd.xlane.f32.xlu0 %v1424_v28 }
0x16bf   : > { %v1426_v30 = vpop.xlane.xlu0 %1425 }
0x16c0   : > { %v1434_v5 = vadd.f32 %v1554_v29, %v1426_v30 }
0x16c2   : > { %1436 = vst.msk [vmem:[%s2425_s6] sm:$0xff] %vm1435_vm2, %v1434_v5 }
0x16c3 PF: > { %p21_p7 = scmp.ge.s32.totalorder %s2034_s27, 5   ;;  %s2437_s23 = smov %s1954_s24 }
0x16c4   : > { %s2438_s24 = smov %s1958_s25  ;;  %s2439_s25 = smov %s2044_s30 }
0x16c5   : > { %s2440_s26 = smov %s2034_s27  ;;  %23 = sbr.rel (!%p21_p7) target bundleno = 8 (0x8), region = 118 }
0x16ca   :  { %1448 = vsyncpa [#allocation9], 1 }
0x16cb   :  { %1450 = vsyncpa [#allocation9 + $0x1], 1 }
0x16cc   :  { %1451 = vsyncpa [#allocation11], 1 }
0x16cd   :  { %1453 = vsyncpa [#allocation11 + $0x1], 1 }
0x16ce   :  { %1454 = vsyncmov [#allocation6] }
0x16d1   :  { %s1455_s5 = vpop.sfrf %1454 }
0x16d2   :  { %p1557_p8 = scmp.ne.s32.totalorder %s1455_s5, 0 }
0x16d4   :  { %1459 = shalt.err (%p1557_p8)  }

</bundles_post_ra>
